<compile_context>
chip_gen: v7x
topology: tpu7x:2x2x1
jax: 0.10.0
libtpu: 0.0.40
codegen_flags: <defaults>
</compile_context>

<pallas_src>
import functools
import math

import jax
import jax.numpy as jnp
from jax.experimental import pallas as pl
from jax.experimental.pallas import tpu as pltpu


# ----------------------------- in-kernel helpers -----------------------------
def _layer_norm(x, gamma, beta, eps=1e-12):
    # matches the reference LayerNorm: var(unbiased=False), eps=1e-12
    mean = jnp.mean(x, axis=-1, keepdims=True)
    var = jnp.mean(jnp.square(x - mean), axis=-1, keepdims=True)
    return gamma * ((x - mean) * jax.lax.rsqrt(var + eps)) + beta


# ------------------------------ fused kernel ---------------------------------
def decoder_kernel(n_head,
                   x_ref, enc_ref, tmask_ref, smask_ref,
                   watt_ref, bqkv_ref, wff1_ref, wff2_ref,
                   bff1_ref, pvec_ref, wout_ref, bout_ref,
                   out_ref, x_vmem):
    l = pl.program_id(1)
    n_layers = pl.num_programs(1)

    # Initialize the resident activation from the embedded input at layer 0.
    @pl.when(l == 0)
    def _():
        x_vmem[...] = x_ref[...]

    x = x_vmem[...]                                   # (S, D) f32
    enc_bf16 = enc_ref[...].astype(jnp.bfloat16)      # (S_enc, D)
    tmask = tmask_ref[...]                            # (S, S) f32 (0 = masked)
    smask = smask_ref[...]                            # (1, S_enc) f32
    bqkv = bqkv_ref[...]                              # (6, H, 1, hd) f32
    pvec = pvec_ref[...]                              # (9, D) f32

    D = x.shape[-1]
    H = n_head
    hd = D // H
    scale = 1.0 / math.sqrt(hd)

    # LN params / packed bias vectors
    g1, b1 = pvec[0:1], pvec[1:2]
    g2, b2 = pvec[2:3], pvec[3:4]
    g3, b3 = pvec[4:5], pvec[5:6]
    bo1, bo2, bf2 = pvec[6:7], pvec[7:8], pvec[8:9]

    def attention(q_in_f32, kv_bf16, mask, w_base, b_base, bo):
        # q_in_f32: (S_q, D) f32, kv_bf16: (S_kv, D) bf16,
        # mask broadcastable to (S_q, S_kv).
        s_q = q_in_f32.shape[0]
        s_kv = kv_bf16.shape[0]
        xq = jnp.broadcast_to(q_in_f32.astype(jnp.bfloat16)[None], (H, s_q, D))
        xkv = jnp.broadcast_to(kv_bf16[None], (H, s_kv, D))

        wq = watt_ref[w_base + 0]                     # (H, hd, D) bf16
        wk = watt_ref[w_base + 1]
        wv = watt_ref[w_base + 2]
        wo = watt_ref[w_base + 3]

        qh = jnp.einsum('hsd,hed->hse', xq, wq,
                        preferred_element_type=jnp.float32) + bqkv[b_base + 0]
        kh = jnp.einsum('hsd,hed->hse', xkv, wk,
                        preferred_element_type=jnp.float32) + bqkv[b_base + 1]
        vh = jnp.einsum('hsd,hed->hse', xkv, wv,
                        preferred_element_type=jnp.float32) + bqkv[b_base + 2]

        s = jnp.einsum('hqe,hke->hqk',
                       qh.astype(jnp.bfloat16), kh.astype(jnp.bfloat16),
                       preferred_element_type=jnp.float32) * scale
        s = jnp.where(mask[None] == 0.0, -10000.0, s)
        s = s - jnp.max(s, axis=-1, keepdims=True)
        p = jnp.exp(s)
        p = p / jnp.sum(p, axis=-1, keepdims=True)

        o = jnp.einsum('hqk,hke->hqe',
                       p.astype(jnp.bfloat16), vh.astype(jnp.bfloat16),
                       preferred_element_type=jnp.float32)
        proj = jnp.einsum('hqe,hed->hqd', o.astype(jnp.bfloat16), wo,
                          preferred_element_type=jnp.float32)   # (H, S_q, D)
        acc = proj[0]
        for h in range(1, H):
            acc = acc + proj[h]
        return acc + bo

    # 1) masked self-attention + residual + LN
    a1 = attention(x, x.astype(jnp.bfloat16), tmask, 0, 0, bo1)
    x1 = _layer_norm(a1 + x, g1, b1)

    # 2) encoder-decoder attention + residual + LN
    a2 = attention(x1, enc_bf16, smask, 4, 3, bo2)
    x2 = _layer_norm(a2 + x1, g2, b2)

    # 3) position-wise FFN + residual + LN
    h1 = jnp.dot(x2.astype(jnp.bfloat16), wff1_ref[...],
                 preferred_element_type=jnp.float32) + bff1_ref[...]
    h1 = jnp.maximum(h1, 0.0)
    f = jnp.dot(h1.astype(jnp.bfloat16), wff2_ref[...],
                preferred_element_type=jnp.float32) + bf2
    x3 = _layer_norm(f + x2, g3, b3)

    # carry activation to the next layer iteration
    x_vmem[...] = x3

    # final vocab projection (lane-dense padded output), only at the last layer
    @pl.when(l == n_layers - 1)
    def _():
        logits = jnp.dot(x3.astype(jnp.bfloat16), wout_ref[...],
                         preferred_element_type=jnp.float32) + bout_ref[...]
        out_ref[...] = logits


def run_decoder(x_emb, enc, trg_mask, src_mask,
                w_att, b_qkv, w_ff1, w_ff2, b_ff1, p_vec, w_out, b_out,
                n_head):
    B, S, D = x_emb.shape
    S_enc = enc.shape[1]
    L = w_att.shape[0]
    H = n_head
    hd = D // H
    F = w_ff1.shape[-1]
    Vp = w_out.shape[-1]

    in_specs = [
        pl.BlockSpec((None, S, D), lambda b, l: (b, 0, 0)),             # x_emb
        pl.BlockSpec((None, S_enc, D), lambda b, l: (b, 0, 0)),         # enc
        pl.BlockSpec((None, None, S, S), lambda b, l: (b, 0, 0, 0)),    # trg_mask
        pl.BlockSpec((None, None, 1, S_enc), lambda b, l: (b, 0, 0, 0)),  # src_mask
        pl.BlockSpec((None, 8, H, hd, D), lambda b, l: (l, 0, 0, 0, 0)),  # attn W
        pl.BlockSpec((None, 6, H, 1, hd), lambda b, l: (l, 0, 0, 0, 0)),  # qkv biases
        pl.BlockSpec((None, D, F), lambda b, l: (l, 0, 0)),             # ffn W1
        pl.BlockSpec((None, F, D), lambda b, l: (l, 0, 0)),             # ffn W2
        pl.BlockSpec((None, 1, F), lambda b, l: (l, 0, 0)),             # ffn b1
        pl.BlockSpec((None, 9, D), lambda b, l: (l, 0, 0)),             # LN + vec biases
        pl.BlockSpec((D, Vp), lambda b, l: (0, 0)),                     # vocab W
        pl.BlockSpec((1, Vp), lambda b, l: (0, 0)),                     # vocab b
    ]
    out_spec = pl.BlockSpec((None, S, Vp), lambda b, l: (b, 0, 0))

    return pl.pallas_call(
        functools.partial(decoder_kernel, n_head),
        out_shape=jax.ShapeDtypeStruct((B, S, Vp), jnp.float32),
        grid=(B, L),
        in_specs=in_specs,
        out_specs=out_spec,
        scratch_shapes=[pltpu.VMEM((S, D), jnp.float32)],
        compiler_params=pltpu.CompilerParams(
            dimension_semantics=("parallel", "arbitrary")),
    )(x_emb, enc, trg_mask, src_mask,
      w_att, b_qkv, w_ff1, w_ff2, b_ff1, p_vec, w_out, b_out)


# ------------------------------ glue (plain JAX) ------------------------------
def sinusoid_positional_encoding(max_len, d_model):
    pos = jnp.arange(max_len, dtype=jnp.float32)[:, None]
    two_i = jnp.arange(0, d_model, 2, dtype=jnp.float32)
    angles = pos / jnp.power(10000.0, two_i / d_model)
    enc = jnp.zeros((max_len, d_model), dtype=jnp.float32)
    enc = enc.at[:, 0::2].set(jnp.sin(angles))
    enc = enc.at[:, 1::2].set(jnp.cos(angles))
    return enc


def init_params(key, vocab, d_model, ffn_hidden, n_head, n_layers, max_len):
    hd = d_model // n_head
    std = 0.02
    keys = jax.random.split(key, n_layers + 2)
    k_tok, k_out = keys[0], keys[1]
    layer_keys = keys[2:]

    tok_table = std * jax.random.normal(k_tok, (vocab, d_model), jnp.float32)
    tok_table = tok_table.at[1].set(0.0)        # padding_idx=1 as in nn.Embedding
    pe = sinusoid_positional_encoding(max_len, d_model)

    def lin(k, din, dout):
        kw, kb = jax.random.split(k)
        return (std * jax.random.normal(kw, (din, dout), jnp.float32),
                std * jax.random.normal(kb, (dout,), jnp.float32))

    def in_proj(w):      # math (D_in, D_out) -> (H, hd, D_in)
        return w.T.reshape(n_head, hd, d_model)

    def out_proj(w):     # math (D_in, D_out) -> (H, hd, D_out)
        return w.reshape(n_head, hd, d_model)

    def head_bias(b):    # (D,) -> (H, 1, hd)
        return b.reshape(n_head, 1, hd)

    w_att, b_qkv, w_ff1, w_ff2, b_ff1, p_vec = [], [], [], [], [], []
    for lk in layer_keys:
        ks = jax.random.split(lk, 10)
        wq1, bq1 = lin(ks[0], d_model, d_model)
        wk1, bk1 = lin(ks[1], d_model, d_model)
        wv1, bv1 = lin(ks[2], d_model, d_model)
        wo1, bo1 = lin(ks[3], d_model, d_model)
        wq2, bq2 = lin(ks[4], d_model, d_model)
        wk2, bk2 = lin(ks[5], d_model, d_model)
        wv2, bv2 = lin(ks[6], d_model, d_model)
        wo2, bo2 = lin(ks[7], d_model, d_model)
        wf1, bf1 = lin(ks[8], d_model, ffn_hidden)
        wf2, bf2 = lin(ks[9], ffn_hidden, d_model)
        g1 = jnp.ones((d_model,), jnp.float32)
        be1 = jnp.zeros((d_model,), jnp.float32)
        g2 = jnp.ones((d_model,), jnp.float32)
        be2 = jnp.zeros((d_model,), jnp.float32)
        g3 = jnp.ones((d_model,), jnp.float32)
        be3 = jnp.zeros((d_model,), jnp.float32)

        w_att.append(jnp.stack([in_proj(wq1), in_proj(wk1), in_proj(wv1),
                                out_proj(wo1),
                                in_proj(wq2), in_proj(wk2), in_proj(wv2),
                                out_proj(wo2)]))              # (8, H, hd, D)
        b_qkv.append(jnp.stack([head_bias(bq1), head_bias(bk1), head_bias(bv1),
                                head_bias(bq2), head_bias(bk2),
                                head_bias(bv2)]))             # (6, H, 1, hd)
        w_ff1.append(wf1)
        w_ff2.append(wf2)
        b_ff1.append(bf1.reshape(1, ffn_hidden))
        p_vec.append(jnp.stack([g1, be1, g2, be2, g3, be3,
                                bo1, bo2, bf2]))              # (9, D)

    kw, kb = jax.random.split(k_out)
    w_out = std * jax.random.normal(kw, (d_model, vocab), jnp.float32)
    b_out = std * jax.random.normal(kb, (vocab,), jnp.float32)
    v_pad = ((vocab + 127) // 128) * 128                      # lane-dense output
    w_out_p = jnp.zeros((d_model, v_pad), jnp.float32).at[:, :vocab].set(w_out)
    b_out_p = jnp.zeros((1, v_pad), jnp.float32).at[:, :vocab].set(b_out)

    return dict(
        tok=tok_table, pe=pe, vocab=vocab,
        w_att=jnp.stack(w_att).astype(jnp.bfloat16),          # (L, 8, H, hd, D)
        b_qkv=jnp.stack(b_qkv),                               # (L, 6, H, 1, hd)
        w_ff1=jnp.stack(w_ff1).astype(jnp.bfloat16),          # (L, D, F)
        w_ff2=jnp.stack(w_ff2).astype(jnp.bfloat16),          # (L, F, D)
        b_ff1=jnp.stack(b_ff1),                               # (L, 1, F)
        p_vec=jnp.stack(p_vec),                               # (L, 9, D)
        w_out=w_out_p.astype(jnp.bfloat16),                   # (D, Vpad)
        b_out=b_out_p,                                        # (1, Vpad)
    )


def decoder_forward(trg_ids, enc_src, trg_mask, src_mask, params, n_head):
    # TODO(synk): dropout is identity (inference); the tiny token-embedding
    # gather + positional add stays in XLA outside the fused kernel.
    S = trg_ids.shape[1]
    x = params['tok'][trg_ids] + params['pe'][None, :S, :]
    logits_padded = run_decoder(
        x, enc_src, trg_mask, src_mask,
        params['w_att'], params['b_qkv'],
        params['w_ff1'], params['w_ff2'], params['b_ff1'],
        params['p_vec'], params['w_out'], params['b_out'], n_head)
    return logits_padded[:, :, :params['vocab']]


# ----------------------------------- main -------------------------------------
if __name__ == "__main__":
    B, S_TRG, S_ENC = 2, 8, 8
    D_MODEL, FFN_HIDDEN, N_HEAD, N_LAYERS = 128, 256, 4, 2
    VOCAB, MAX_LEN = 50, 16

    key = jax.random.PRNGKey(0)
    k_ids, k_enc, k_par = jax.random.split(key, 3)

    # inputs
    trg_ids = jax.random.randint(k_ids, (B, S_TRG), 0, VOCAB)
    enc_src = jax.random.normal(k_enc, (B, S_ENC, D_MODEL), jnp.float32)

    # masks (PyTorch convention: 0 = masked out)
    causal = jnp.tril(jnp.ones((S_TRG, S_TRG), jnp.float32))
    trg_mask = jnp.broadcast_to(causal, (B, 1, S_TRG, S_TRG))
    src_mask = jnp.ones((B, 1, 1, S_ENC), jnp.float32)

    params = init_params(k_par, VOCAB, D_MODEL, FFN_HIDDEN,
                         N_HEAD, N_LAYERS, MAX_LEN)

    out = decoder_forward(trg_ids, enc_src, trg_mask, src_mask, params, N_HEAD)
    jax.block_until_ready(out)
    assert out.shape == (B, S_TRG, VOCAB)
    print("KERNEL_OK")
</pallas_src>

<mosaic_0001>
module attributes {stable_mosaic.version = 11 : i64} {
  func.func @decoder_kernel(%arg0: i32, %arg1: i32, %arg2: memref<1x8x128xf32, #tpu.memory_space<vmem>>, %arg3: memref<1x8x128xf32, #tpu.memory_space<vmem>>, %arg4: memref<1x1x8x8xf32, #tpu.memory_space<vmem>>, %arg5: memref<1x1x1x8xf32, #tpu.memory_space<vmem>>, %arg6: memref<1x8x4x32x128xbf16, #tpu.memory_space<vmem>>, %arg7: memref<1x6x4x1x32xf32, #tpu.memory_space<vmem>>, %arg8: memref<1x128x256xbf16, #tpu.memory_space<vmem>>, %arg9: memref<1x256x128xbf16, #tpu.memory_space<vmem>>, %arg10: memref<1x1x256xf32, #tpu.memory_space<vmem>>, %arg11: memref<1x9x128xf32, #tpu.memory_space<vmem>>, %arg12: memref<128x128xbf16, #tpu.memory_space<vmem>>, %arg13: memref<1x128xf32, #tpu.memory_space<vmem>>, %arg14: memref<1x8x128xf32, #tpu.memory_space<vmem>>, %arg15: memref<8x128xf32, #tpu.memory_space<vmem>>) attributes {dimension_semantics = [#tpu.dimension_semantics<parallel>, #tpu.dimension_semantics<arbitrary>], iteration_bounds = array<i64: 2, 2>, scalar_prefetch = 0 : i64, scratch_operands = 1 : i64, tpu.core_type = #tpu.core_type<tc>, window_params = [{transform_indices = @transform_0, window_bounds = array<i64: 1, 8, 128>}, {transform_indices = @transform_1, window_bounds = array<i64: 1, 8, 128>}, {transform_indices = @transform_2, window_bounds = array<i64: 1, 1, 8, 8>}, {transform_indices = @transform_3, window_bounds = array<i64: 1, 1, 1, 8>}, {transform_indices = @transform_4, window_bounds = array<i64: 1, 8, 4, 32, 128>}, {transform_indices = @transform_5, window_bounds = array<i64: 1, 6, 4, 1, 32>}, {transform_indices = @transform_6, window_bounds = array<i64: 1, 128, 256>}, {transform_indices = @transform_7, window_bounds = array<i64: 1, 256, 128>}, {transform_indices = @transform_8, window_bounds = array<i64: 1, 1, 256>}, {transform_indices = @transform_9, window_bounds = array<i64: 1, 9, 128>}, {pipeline_mode = #tpu.pipeline_mode<synchronous>, transform_indices = @transform_10, window_bounds = array<i64: 128, 128>}, {pipeline_mode = #tpu.pipeline_mode<synchronous>, transform_indices = @transform_11, window_bounds = array<i64: 1, 128>}, {transform_indices = @transform_12, window_bounds = array<i64: 1, 8, 128>}]} {
    %c0_i32 = arith.constant 0 : i32
    %0 = arith.cmpi eq, %arg1, %c0_i32 : i32
    %1 = arith.extui %0 : i1 to i32
    %c0_i32_0 = arith.constant 0 : i32
    %2 = arith.cmpi ne, %1, %c0_i32_0 : i32
    scf.if %2 {
      %c0_105 = arith.constant 0 : index
      %c0_106 = arith.constant 0 : index
      %c0_107 = arith.constant 0 : index
      %252 = vector.load %arg2[%c0_105, %c0_106, %c0_107] : memref<1x8x128xf32, #tpu.memory_space<vmem>>, vector<1x8x128xf32>
      %253 = vector.shape_cast %252 : vector<1x8x128xf32> to vector<8x128xf32>
      %c0_108 = arith.constant 0 : index
      %c0_109 = arith.constant 0 : index
      %254 = vector.load %arg15[%c0_108, %c0_109] : memref<8x128xf32, #tpu.memory_space<vmem>>, vector<8x128xf32>
      tpu.vector_store %arg15[%c0_108, %c0_109], %253 {strides = array<i32>} : memref<8x128xf32, #tpu.memory_space<vmem>>, vector<8x128xf32>,
    } else {
    }
    %c0 = arith.constant 0 : index
    %c0_1 = arith.constant 0 : index
    %3 = vector.load %arg15[%c0, %c0_1] : memref<8x128xf32, #tpu.memory_space<vmem>>, vector<8x128xf32>
    %c0_2 = arith.constant 0 : index
    %c0_3 = arith.constant 0 : index
    %c0_4 = arith.constant 0 : index
    %4 = vector.load %arg3[%c0_2, %c0_3, %c0_4] : memref<1x8x128xf32, #tpu.memory_space<vmem>>, vector<1x8x128xf32>
    %5 = vector.shape_cast %4 : vector<1x8x128xf32> to vector<8x128xf32>
    %6 = arith.truncf %5 : vector<8x128xf32> to vector<8x128xbf16>
    %c0_5 = arith.constant 0 : index
    %c0_6 = arith.constant 0 : index
    %c0_7 = arith.constant 0 : index
    %c0_8 = arith.constant 0 : index
    %7 = vector.load %arg4[%c0_5, %c0_6, %c0_7, %c0_8] : memref<1x1x8x8xf32, #tpu.memory_space<vmem>>, vector<1x1x8x8xf32>
    %8 = vector.shape_cast %7 : vector<1x1x8x8xf32> to vector<8x8xf32>
    %c0_9 = arith.constant 0 : index
    %c0_10 = arith.constant 0 : index
    %c0_11 = arith.constant 0 : index
    %c0_12 = arith.constant 0 : index
    %9 = vector.load %arg5[%c0_9, %c0_10, %c0_11, %c0_12] : memref<1x1x1x8xf32, #tpu.memory_space<vmem>>, vector<1x1x1x8xf32>
    %10 = vector.shape_cast %9 : vector<1x1x1x8xf32> to vector<1x8xf32>
    %c0_13 = arith.constant 0 : index
    %c0_14 = arith.constant 0 : index
    %c0_15 = arith.constant 0 : index
    %c0_16 = arith.constant 0 : index
    %c0_17 = arith.constant 0 : index
    %11 = vector.load %arg7[%c0_13, %c0_14, %c0_15, %c0_16, %c0_17] : memref<1x6x4x1x32xf32, #tpu.memory_space<vmem>>, vector<1x6x4x1x32xf32>
    %12 = vector.shape_cast %11 : vector<1x6x4x1x32xf32> to vector<6x4x1x32xf32>
    %c0_18 = arith.constant 0 : index
    %c0_19 = arith.constant 0 : index
    %c0_20 = arith.constant 0 : index
    %13 = vector.load %arg11[%c0_18, %c0_19, %c0_20] : memref<1x9x128xf32, #tpu.memory_space<vmem>>, vector<1x9x128xf32>
    %14 = vector.shape_cast %13 : vector<1x9x128xf32> to vector<9x128xf32>
    %15 = vector.extract_strided_slice %14 {offsets = [0, 0], sizes = [1, 128], strides = [1, 1]} : vector<9x128xf32> to vector<1x128xf32>
    %16 = vector.extract_strided_slice %14 {offsets = [1, 0], sizes = [1, 128], strides = [1, 1]} : vector<9x128xf32> to vector<1x128xf32>
    %17 = vector.extract_strided_slice %14 {offsets = [2, 0], sizes = [1, 128], strides = [1, 1]} : vector<9x128xf32> to vector<1x128xf32>
    %18 = vector.extract_strided_slice %14 {offsets = [3, 0], sizes = [1, 128], strides = [1, 1]} : vector<9x128xf32> to vector<1x128xf32>
    %19 = vector.extract_strided_slice %14 {offsets = [4, 0], sizes = [1, 128], strides = [1, 1]} : vector<9x128xf32> to vector<1x128xf32>
    %20 = vector.extract_strided_slice %14 {offsets = [5, 0], sizes = [1, 128], strides = [1, 1]} : vector<9x128xf32> to vector<1x128xf32>
    %21 = vector.extract_strided_slice %14 {offsets = [6, 0], sizes = [1, 128], strides = [1, 1]} : vector<9x128xf32> to vector<1x128xf32>
    %22 = vector.extract_strided_slice %14 {offsets = [7, 0], sizes = [1, 128], strides = [1, 1]} : vector<9x128xf32> to vector<1x128xf32>
    %23 = vector.extract_strided_slice %14 {offsets = [8, 0], sizes = [1, 128], strides = [1, 1]} : vector<9x128xf32> to vector<1x128xf32>
    %24 = arith.truncf %3 : vector<8x128xf32> to vector<8x128xbf16>
    %25 = arith.truncf %3 : vector<8x128xf32> to vector<8x128xbf16>
    %26 = vector.shape_cast %25 : vector<8x128xbf16> to vector<1x8x128xbf16>
    %27 = vector.shape_cast %26 : vector<1x8x128xbf16> to vector<1x8x128xbf16>
    %28 = vector.broadcast %27 : vector<1x8x128xbf16> to vector<4x8x128xbf16>
    %29 = vector.shape_cast %24 : vector<8x128xbf16> to vector<1x8x128xbf16>
    %30 = vector.shape_cast %29 : vector<1x8x128xbf16> to vector<1x8x128xbf16>
    %31 = vector.broadcast %30 : vector<1x8x128xbf16> to vector<4x8x128xbf16>
    %c0_21 = arith.constant 0 : index
    %c0_22 = arith.constant 0 : index
    %c0_23 = arith.constant 0 : index
    %c0_24 = arith.constant 0 : index
    %c0_25 = arith.constant 0 : index
    %32 = vector.load %arg6[%c0_21, %c0_22, %c0_23, %c0_24, %c0_25] : memref<1x8x4x32x128xbf16, #tpu.memory_space<vmem>>, vector<1x1x4x32x128xbf16>
    %33 = vector.shape_cast %32 : vector<1x1x4x32x128xbf16> to vector<4x32x128xbf16>
    %c0_26 = arith.constant 0 : index
    %c1 = arith.constant 1 : index
    %c0_27 = arith.constant 0 : index
    %c0_28 = arith.constant 0 : index
    %c0_29 = arith.constant 0 : index
    %34 = vector.load %arg6[%c0_26, %c1, %c0_27, %c0_28, %c0_29] : memref<1x8x4x32x128xbf16, #tpu.memory_space<vmem>>, vector<1x1x4x32x128xbf16>
    %35 = vector.shape_cast %34 : vector<1x1x4x32x128xbf16> to vector<4x32x128xbf16>
    %c0_30 = arith.constant 0 : index
    %c2 = arith.constant 2 : index
    %c0_31 = arith.constant 0 : index
    %c0_32 = arith.constant 0 : index
    %c0_33 = arith.constant 0 : index
    %36 = vector.load %arg6[%c0_30, %c2, %c0_31, %c0_32, %c0_33] : memref<1x8x4x32x128xbf16, #tpu.memory_space<vmem>>, vector<1x1x4x32x128xbf16>
    %37 = vector.shape_cast %36 : vector<1x1x4x32x128xbf16> to vector<4x32x128xbf16>
    %c0_34 = arith.constant 0 : index
    %c3 = arith.constant 3 : index
    %c0_35 = arith.constant 0 : index
    %c0_36 = arith.constant 0 : index
    %c0_37 = arith.constant 0 : index
    %38 = vector.load %arg6[%c0_34, %c3, %c0_35, %c0_36, %c0_37] : memref<1x8x4x32x128xbf16, #tpu.memory_space<vmem>>, vector<1x1x4x32x128xbf16>
    %39 = vector.shape_cast %38 : vector<1x1x4x32x128xbf16> to vector<4x32x128xbf16>
    "tpu.trace_start"() <{level = 10 : i32, message = "hsd,hed->hse"}> : () -> ()
    %cst = arith.constant dense<0.000000e+00> : vector<4x8x32xf32>
    %40 = tpu.matmul %28, %33, %cst {dimension_numbers = #tpu.dot_dimension_numbers<[2], [2], [1], [1], [0, 0, 0, 1, 1, 1], [0], [0]>} : vector<4x8x128xbf16>, vector<4x32x128xbf16>, vector<4x8x32xf32> -> vector<4x8x32xf32>
    "tpu.trace_stop"() : () -> ()
    %41 = vector.extract_strided_slice %12 {offsets = [0, 0, 0, 0], sizes = [1, 4, 1, 32], strides = [1, 1, 1, 1]} : vector<6x4x1x32xf32> to vector<1x4x1x32xf32>
    %42 = vector.shape_cast %41 : vector<1x4x1x32xf32> to vector<4x1x32xf32>
    %43 = vector.broadcast %42 : vector<4x1x32xf32> to vector<4x8x32xf32>
    %44 = arith.addf %40, %43 : vector<4x8x32xf32>
    "tpu.trace_start"() <{level = 10 : i32, message = "hsd,hed->hse"}> : () -> ()
    %cst_38 = arith.constant dense<0.000000e+00> : vector<4x8x32xf32>
    %45 = tpu.matmul %31, %35, %cst_38 {dimension_numbers = #tpu.dot_dimension_numbers<[2], [2], [1], [1], [0, 0, 0, 1, 1, 1], [0], [0]>} : vector<4x8x128xbf16>, vector<4x32x128xbf16>, vector<4x8x32xf32> -> vector<4x8x32xf32>
    "tpu.trace_stop"() : () -> ()
    %46 = vector.extract_strided_slice %12 {offsets = [1, 0, 0, 0], sizes = [1, 4, 1, 32], strides = [1, 1, 1, 1]} : vector<6x4x1x32xf32> to vector<1x4x1x32xf32>
    %47 = vector.shape_cast %46 : vector<1x4x1x32xf32> to vector<4x1x32xf32>
    %48 = vector.broadcast %47 : vector<4x1x32xf32> to vector<4x8x32xf32>
    %49 = arith.addf %45, %48 : vector<4x8x32xf32>
    "tpu.trace_start"() <{level = 10 : i32, message = "hsd,hed->hse"}> : () -> ()
    %cst_39 = arith.constant dense<0.000000e+00> : vector<4x8x32xf32>
    %50 = tpu.matmul %31, %37, %cst_39 {dimension_numbers = #tpu.dot_dimension_numbers<[2], [2], [1], [1], [0, 0, 0, 1, 1, 1], [0], [0]>} : vector<4x8x128xbf16>, vector<4x32x128xbf16>, vector<4x8x32xf32> -> vector<4x8x32xf32>
    "tpu.trace_stop"() : () -> ()
    %51 = vector.extract_strided_slice %12 {offsets = [2, 0, 0, 0], sizes = [1, 4, 1, 32], strides = [1, 1, 1, 1]} : vector<6x4x1x32xf32> to vector<1x4x1x32xf32>
    %52 = vector.shape_cast %51 : vector<1x4x1x32xf32> to vector<4x1x32xf32>
    %53 = vector.broadcast %52 : vector<4x1x32xf32> to vector<4x8x32xf32>
    %54 = arith.addf %50, %53 : vector<4x8x32xf32>
    %55 = arith.truncf %44 : vector<4x8x32xf32> to vector<4x8x32xbf16>
    %56 = arith.truncf %49 : vector<4x8x32xf32> to vector<4x8x32xbf16>
    "tpu.trace_start"() <{level = 10 : i32, message = "hqe,hke->hqk"}> : () -> ()
    %cst_40 = arith.constant dense<0.000000e+00> : vector<4x8x8xf32>
    %57 = tpu.matmul %55, %56, %cst_40 {dimension_numbers = #tpu.dot_dimension_numbers<[2], [2], [1], [1], [0, 0, 0, 1, 1, 1], [0], [0]>} : vector<4x8x32xbf16>, vector<4x8x32xbf16>, vector<4x8x8xf32> -> vector<4x8x8xf32>
    "tpu.trace_stop"() : () -> ()
    %cst_41 = arith.constant 0.176776692 : f32
    %58 = vector.broadcast %cst_41 : f32 to vector<4x8x8xf32>
    %59 = arith.mulf %57, %58 : vector<4x8x8xf32>
    %60 = vector.shape_cast %8 : vector<8x8xf32> to vector<1x8x8xf32>
    %cst_42 = arith.constant 0.000000e+00 : f32
    %61 = vector.broadcast %cst_42 : f32 to vector<1x8x8xf32>
    %62 = arith.cmpf oeq, %60, %61 : vector<1x8x8xf32>
    %cst_43 = arith.constant -1.000000e+04 : f32
    %63 = vector.shape_cast %62 : vector<1x8x8xi1> to vector<1x8x8xi1>
    %64 = vector.broadcast %63 : vector<1x8x8xi1> to vector<4x8x8xi1>
    %65 = vector.broadcast %cst_43 : f32 to vector<4x8x8xf32>
    %66 = arith.select %64, %65, %59 : vector<4x8x8xi1>, vector<4x8x8xf32>
    %cst_44 = arith.constant dense<0xFF800000> : vector<4x8xf32>
    %67 = vector.multi_reduction <maximumf>, %66, %cst_44 [2] : vector<4x8x8xf32> to vector<4x8xf32>
    %68 = vector.shape_cast %67 : vector<4x8xf32> to vector<4x8x1xf32>
    %69 = vector.broadcast %68 : vector<4x8x1xf32> to vector<4x8x8xf32>
    %70 = arith.subf %66, %69 : vector<4x8x8xf32>
    %71 = math.exp %70 : vector<4x8x8xf32>
    %cst_45 = arith.constant dense<0.000000e+00> : vector<4x8xf32>
    %72 = vector.multi_reduction <add>, %71, %cst_45 [2] : vector<4x8x8xf32> to vector<4x8xf32>
    %73 = vector.shape_cast %72 : vector<4x8xf32> to vector<4x8x1xf32>
    %74 = vector.broadcast %73 : vector<4x8x1xf32> to vector<4x8x8xf32>
    %75 = arith.divf %71, %74 : vector<4x8x8xf32>
    %76 = arith.truncf %75 : vector<4x8x8xf32> to vector<4x8x8xbf16>
    %77 = arith.truncf %54 : vector<4x8x32xf32> to vector<4x8x32xbf16>
    "tpu.trace_start"() <{level = 10 : i32, message = "hqk,hke->hqe"}> : () -> ()
    %cst_46 = arith.constant dense<0.000000e+00> : vector<4x8x32xf32>
    %78 = tpu.matmul %76, %77, %cst_46 {dimension_numbers = #tpu.dot_dimension_numbers<[2], [1], [1], [2], [0, 0, 0, 1, 1, 2], [0], [0]>} : vector<4x8x8xbf16>, vector<4x8x32xbf16>, vector<4x8x32xf32> -> vector<4x8x32xf32>
    "tpu.trace_stop"() : () -> ()
    %79 = arith.truncf %78 : vector<4x8x32xf32> to vector<4x8x32xbf16>
    "tpu.trace_start"() <{level = 10 : i32, message = "hqe,hed->hqd"}> : () -> ()
    %cst_47 = arith.constant dense<0.000000e+00> : vector<4x8x128xf32>
    %80 = tpu.matmul %79, %39, %cst_47 {dimension_numbers = #tpu.dot_dimension_numbers<[2], [1], [1], [2], [0, 0, 0, 1, 1, 2], [0], [0]>} : vector<4x8x32xbf16>, vector<4x32x128xbf16>, vector<4x8x128xf32> -> vector<4x8x128xf32>
    "tpu.trace_stop"() : () -> ()
    %81 = vector.extract_strided_slice %80 {offsets = [0, 0, 0], sizes = [1, 8, 128], strides = [1, 1, 1]} : vector<4x8x128xf32> to vector<1x8x128xf32>
    %82 = vector.shape_cast %81 : vector<1x8x128xf32> to vector<8x128xf32>
    %83 = vector.extract_strided_slice %80 {offsets = [1, 0, 0], sizes = [1, 8, 128], strides = [1, 1, 1]} : vector<4x8x128xf32> to vector<1x8x128xf32>
    %84 = vector.shape_cast %83 : vector<1x8x128xf32> to vector<8x128xf32>
    %85 = arith.addf %82, %84 : vector<8x128xf32>
    %86 = vector.extract_strided_slice %80 {offsets = [2, 0, 0], sizes = [1, 8, 128], strides = [1, 1, 1]} : vector<4x8x128xf32> to vector<1x8x128xf32>
    %87 = vector.shape_cast %86 : vector<1x8x128xf32> to vector<8x128xf32>
    %88 = arith.addf %85, %87 : vector<8x128xf32>
    %89 = vector.extract_strided_slice %80 {offsets = [3, 0, 0], sizes = [1, 8, 128], strides = [1, 1, 1]} : vector<4x8x128xf32> to vector<1x8x128xf32>
    %90 = vector.shape_cast %89 : vector<1x8x128xf32> to vector<8x128xf32>
    %91 = arith.addf %88, %90 : vector<8x128xf32>
    %92 = vector.broadcast %21 : vector<1x128xf32> to vector<8x128xf32>
    %93 = arith.addf %91, %92 : vector<8x128xf32>
    %94 = arith.addf %93, %3 : vector<8x128xf32>
    %cst_48 = arith.constant dense<0.000000e+00> : vector<8xf32>
    %95 = vector.multi_reduction <add>, %94, %cst_48 [1] : vector<8x128xf32> to vector<8xf32>
    %96 = vector.shape_cast %95 : vector<8xf32> to vector<8x1xf32>
    %cst_49 = arith.constant 1.280000e+02 : f32
    %97 = vector.broadcast %cst_49 : f32 to vector<8x1xf32>
    %98 = arith.divf %96, %97 : vector<8x1xf32>
    %99 = vector.broadcast %98 : vector<8x1xf32> to vector<8x128xf32>
    %100 = arith.subf %94, %99 : vector<8x128xf32>
    %101 = arith.mulf %100, %100 : vector<8x128xf32>
    %cst_50 = arith.constant dense<0.000000e+00> : vector<8xf32>
    %102 = vector.multi_reduction <add>, %101, %cst_50 [1] : vector<8x128xf32> to vector<8xf32>
    %103 = vector.shape_cast %102 : vector<8xf32> to vector<8x1xf32>
    %cst_51 = arith.constant 1.280000e+02 : f32
    %104 = vector.broadcast %cst_51 : f32 to vector<8x1xf32>
    %105 = arith.divf %103, %104 : vector<8x1xf32>
    %106 = vector.broadcast %98 : vector<8x1xf32> to vector<8x128xf32>
    %107 = arith.subf %94, %106 : vector<8x128xf32>
    %cst_52 = arith.constant 9.99999996E-13 : f32
    %108 = vector.broadcast %cst_52 : f32 to vector<8x1xf32>
    %109 = arith.addf %105, %108 : vector<8x1xf32>
    %110 = math.rsqrt %109 : vector<8x1xf32>
    %111 = vector.broadcast %110 : vector<8x1xf32> to vector<8x128xf32>
    %112 = arith.mulf %107, %111 : vector<8x128xf32>
    %113 = vector.broadcast %15 : vector<1x128xf32> to vector<8x128xf32>
    %114 = arith.mulf %113, %112 : vector<8x128xf32>
    %115 = vector.broadcast %16 : vector<1x128xf32> to vector<8x128xf32>
    %116 = arith.addf %114, %115 : vector<8x128xf32>
    %117 = arith.truncf %116 : vector<8x128xf32> to vector<8x128xbf16>
    %118 = vector.shape_cast %117 : vector<8x128xbf16> to vector<1x8x128xbf16>
    %119 = vector.shape_cast %118 : vector<1x8x128xbf16> to vector<1x8x128xbf16>
    %120 = vector.broadcast %119 : vector<1x8x128xbf16> to vector<4x8x128xbf16>
    %121 = vector.shape_cast %6 : vector<8x128xbf16> to vector<1x8x128xbf16>
    %122 = vector.shape_cast %121 : vector<1x8x128xbf16> to vector<1x8x128xbf16>
    %123 = vector.broadcast %122 : vector<1x8x128xbf16> to vector<4x8x128xbf16>
    %c0_53 = arith.constant 0 : index
    %c4 = arith.constant 4 : index
    %c0_54 = arith.constant 0 : index
    %c0_55 = arith.constant 0 : index
    %c0_56 = arith.constant 0 : index
    %124 = vector.load %arg6[%c0_53, %c4, %c0_54, %c0_55, %c0_56] : memref<1x8x4x32x128xbf16, #tpu.memory_space<vmem>>, vector<1x1x4x32x128xbf16>
    %125 = vector.shape_cast %124 : vector<1x1x4x32x128xbf16> to vector<4x32x128xbf16>
    %c0_57 = arith.constant 0 : index
    %c5 = arith.constant 5 : index
    %c0_58 = arith.constant 0 : index
    %c0_59 = arith.constant 0 : index
    %c0_60 = arith.constant 0 : index
    %126 = vector.load %arg6[%c0_57, %c5, %c0_58, %c0_59, %c0_60] : memref<1x8x4x32x128xbf16, #tpu.memory_space<vmem>>, vector<1x1x4x32x128xbf16>
    %127 = vector.shape_cast %126 : vector<1x1x4x32x128xbf16> to vector<4x32x128xbf16>
    %c0_61 = arith.constant 0 : index
    %c6 = arith.constant 6 : index
    %c0_62 = arith.constant 0 : index
    %c0_63 = arith.constant 0 : index
    %c0_64 = arith.constant 0 : index
    %128 = vector.load %arg6[%c0_61, %c6, %c0_62, %c0_63, %c0_64] : memref<1x8x4x32x128xbf16, #tpu.memory_space<vmem>>, vector<1x1x4x32x128xbf16>
    %129 = vector.shape_cast %128 : vector<1x1x4x32x128xbf16> to vector<4x32x128xbf16>
    %c0_65 = arith.constant 0 : index
    %c7 = arith.constant 7 : index
    %c0_66 = arith.constant 0 : index
    %c0_67 = arith.constant 0 : index
    %c0_68 = arith.constant 0 : index
    %130 = vector.load %arg6[%c0_65, %c7, %c0_66, %c0_67, %c0_68] : memref<1x8x4x32x128xbf16, #tpu.memory_space<vmem>>, vector<1x1x4x32x128xbf16>
    %131 = vector.shape_cast %130 : vector<1x1x4x32x128xbf16> to vector<4x32x128xbf16>
    "tpu.trace_start"() <{level = 10 : i32, message = "hsd,hed->hse"}> : () -> ()
    %cst_69 = arith.constant dense<0.000000e+00> : vector<4x8x32xf32>
    %132 = tpu.matmul %120, %125, %cst_69 {dimension_numbers = #tpu.dot_dimension_numbers<[2], [2], [1], [1], [0, 0, 0, 1, 1, 1], [0], [0]>} : vector<4x8x128xbf16>, vector<4x32x128xbf16>, vector<4x8x32xf32> -> vector<4x8x32xf32>
    "tpu.trace_stop"() : () -> ()
    %133 = vector.extract_strided_slice %12 {offsets = [3, 0, 0, 0], sizes = [1, 4, 1, 32], strides = [1, 1, 1, 1]} : vector<6x4x1x32xf32> to vector<1x4x1x32xf32>
    %134 = vector.shape_cast %133 : vector<1x4x1x32xf32> to vector<4x1x32xf32>
    %135 = vector.broadcast %134 : vector<4x1x32xf32> to vector<4x8x32xf32>
    %136 = arith.addf %132, %135 : vector<4x8x32xf32>
    "tpu.trace_start"() <{level = 10 : i32, message = "hsd,hed->hse"}> : () -> ()
    %cst_70 = arith.constant dense<0.000000e+00> : vector<4x8x32xf32>
    %137 = tpu.matmul %123, %127, %cst_70 {dimension_numbers = #tpu.dot_dimension_numbers<[2], [2], [1], [1], [0, 0, 0, 1, 1, 1], [0], [0]>} : vector<4x8x128xbf16>, vector<4x32x128xbf16>, vector<4x8x32xf32> -> vector<4x8x32xf32>
    "tpu.trace_stop"() : () -> ()
    %138 = vector.extract_strided_slice %12 {offsets = [4, 0, 0, 0], sizes = [1, 4, 1, 32], strides = [1, 1, 1, 1]} : vector<6x4x1x32xf32> to vector<1x4x1x32xf32>
    %139 = vector.shape_cast %138 : vector<1x4x1x32xf32> to vector<4x1x32xf32>
    %140 = vector.broadcast %139 : vector<4x1x32xf32> to vector<4x8x32xf32>
    %141 = arith.addf %137, %140 : vector<4x8x32xf32>
    "tpu.trace_start"() <{level = 10 : i32, message = "hsd,hed->hse"}> : () -> ()
    %cst_71 = arith.constant dense<0.000000e+00> : vector<4x8x32xf32>
    %142 = tpu.matmul %123, %129, %cst_71 {dimension_numbers = #tpu.dot_dimension_numbers<[2], [2], [1], [1], [0, 0, 0, 1, 1, 1], [0], [0]>} : vector<4x8x128xbf16>, vector<4x32x128xbf16>, vector<4x8x32xf32> -> vector<4x8x32xf32>
    "tpu.trace_stop"() : () -> ()
    %143 = vector.extract_strided_slice %12 {offsets = [5, 0, 0, 0], sizes = [1, 4, 1, 32], strides = [1, 1, 1, 1]} : vector<6x4x1x32xf32> to vector<1x4x1x32xf32>
    %144 = vector.shape_cast %143 : vector<1x4x1x32xf32> to vector<4x1x32xf32>
    %145 = vector.broadcast %144 : vector<4x1x32xf32> to vector<4x8x32xf32>
    %146 = arith.addf %142, %145 : vector<4x8x32xf32>
    %147 = arith.truncf %136 : vector<4x8x32xf32> to vector<4x8x32xbf16>
    %148 = arith.truncf %141 : vector<4x8x32xf32> to vector<4x8x32xbf16>
    "tpu.trace_start"() <{level = 10 : i32, message = "hqe,hke->hqk"}> : () -> ()
    %cst_72 = arith.constant dense<0.000000e+00> : vector<4x8x8xf32>
    %149 = tpu.matmul %147, %148, %cst_72 {dimension_numbers = #tpu.dot_dimension_numbers<[2], [2], [1], [1], [0, 0, 0, 1, 1, 1], [0], [0]>} : vector<4x8x32xbf16>, vector<4x8x32xbf16>, vector<4x8x8xf32> -> vector<4x8x8xf32>
    "tpu.trace_stop"() : () -> ()
    %cst_73 = arith.constant 0.176776692 : f32
    %150 = vector.broadcast %cst_73 : f32 to vector<4x8x8xf32>
    %151 = arith.mulf %149, %150 : vector<4x8x8xf32>
    %152 = vector.shape_cast %10 : vector<1x8xf32> to vector<1x1x8xf32>
    %cst_74 = arith.constant 0.000000e+00 : f32
    %153 = vector.broadcast %cst_74 : f32 to vector<1x1x8xf32>
    %154 = arith.cmpf oeq, %152, %153 : vector<1x1x8xf32>
    %cst_75 = arith.constant -1.000000e+04 : f32
    %155 = vector.shape_cast %154 : vector<1x1x8xi1> to vector<1x1x8xi1>
    %156 = vector.broadcast %155 : vector<1x1x8xi1> to vector<4x8x8xi1>
    %157 = vector.broadcast %cst_75 : f32 to vector<4x8x8xf32>
    %158 = arith.select %156, %157, %151 : vector<4x8x8xi1>, vector<4x8x8xf32>
    %cst_76 = arith.constant dense<0xFF800000> : vector<4x8xf32>
    %159 = vector.multi_reduction <maximumf>, %158, %cst_76 [2] : vector<4x8x8xf32> to vector<4x8xf32>
    %160 = vector.shape_cast %159 : vector<4x8xf32> to vector<4x8x1xf32>
    %161 = vector.broadcast %160 : vector<4x8x1xf32> to vector<4x8x8xf32>
    %162 = arith.subf %158, %161 : vector<4x8x8xf32>
    %163 = math.exp %162 : vector<4x8x8xf32>
    %cst_77 = arith.constant dense<0.000000e+00> : vector<4x8xf32>
    %164 = vector.multi_reduction <add>, %163, %cst_77 [2] : vector<4x8x8xf32> to vector<4x8xf32>
    %165 = vector.shape_cast %164 : vector<4x8xf32> to vector<4x8x1xf32>
    %166 = vector.broadcast %165 : vector<4x8x1xf32> to vector<4x8x8xf32>
    %167 = arith.divf %163, %166 : vector<4x8x8xf32>
    %168 = arith.truncf %167 : vector<4x8x8xf32> to vector<4x8x8xbf16>
    %169 = arith.truncf %146 : vector<4x8x32xf32> to vector<4x8x32xbf16>
    "tpu.trace_start"() <{level = 10 : i32, message = "hqk,hke->hqe"}> : () -> ()
    %cst_78 = arith.constant dense<0.000000e+00> : vector<4x8x32xf32>
    %170 = tpu.matmul %168, %169, %cst_78 {dimension_numbers = #tpu.dot_dimension_numbers<[2], [1], [1], [2], [0, 0, 0, 1, 1, 2], [0], [0]>} : vector<4x8x8xbf16>, vector<4x8x32xbf16>, vector<4x8x32xf32> -> vector<4x8x32xf32>
    "tpu.trace_stop"() : () -> ()
    %171 = arith.truncf %170 : vector<4x8x32xf32> to vector<4x8x32xbf16>
    "tpu.trace_start"() <{level = 10 : i32, message = "hqe,hed->hqd"}> : () -> ()
    %cst_79 = arith.constant dense<0.000000e+00> : vector<4x8x128xf32>
    %172 = tpu.matmul %171, %131, %cst_79 {dimension_numbers = #tpu.dot_dimension_numbers<[2], [1], [1], [2], [0, 0, 0, 1, 1, 2], [0], [0]>} : vector<4x8x32xbf16>, vector<4x32x128xbf16>, vector<4x8x128xf32> -> vector<4x8x128xf32>
    "tpu.trace_stop"() : () -> ()
    %173 = vector.extract_strided_slice %172 {offsets = [0, 0, 0], sizes = [1, 8, 128], strides = [1, 1, 1]} : vector<4x8x128xf32> to vector<1x8x128xf32>
    %174 = vector.shape_cast %173 : vector<1x8x128xf32> to vector<8x128xf32>
    %175 = vector.extract_strided_slice %172 {offsets = [1, 0, 0], sizes = [1, 8, 128], strides = [1, 1, 1]} : vector<4x8x128xf32> to vector<1x8x128xf32>
    %176 = vector.shape_cast %175 : vector<1x8x128xf32> to vector<8x128xf32>
    %177 = arith.addf %174, %176 : vector<8x128xf32>
    %178 = vector.extract_strided_slice %172 {offsets = [2, 0, 0], sizes = [1, 8, 128], strides = [1, 1, 1]} : vector<4x8x128xf32> to vector<1x8x128xf32>
    %179 = vector.shape_cast %178 : vector<1x8x128xf32> to vector<8x128xf32>
    %180 = arith.addf %177, %179 : vector<8x128xf32>
    %181 = vector.extract_strided_slice %172 {offsets = [3, 0, 0], sizes = [1, 8, 128], strides = [1, 1, 1]} : vector<4x8x128xf32> to vector<1x8x128xf32>
    %182 = vector.shape_cast %181 : vector<1x8x128xf32> to vector<8x128xf32>
    %183 = arith.addf %180, %182 : vector<8x128xf32>
    %184 = vector.broadcast %22 : vector<1x128xf32> to vector<8x128xf32>
    %185 = arith.addf %183, %184 : vector<8x128xf32>
    %186 = arith.addf %185, %116 : vector<8x128xf32>
    %cst_80 = arith.constant dense<0.000000e+00> : vector<8xf32>
    %187 = vector.multi_reduction <add>, %186, %cst_80 [1] : vector<8x128xf32> to vector<8xf32>
    %188 = vector.shape_cast %187 : vector<8xf32> to vector<8x1xf32>
    %cst_81 = arith.constant 1.280000e+02 : f32
    %189 = vector.broadcast %cst_81 : f32 to vector<8x1xf32>
    %190 = arith.divf %188, %189 : vector<8x1xf32>
    %191 = vector.broadcast %190 : vector<8x1xf32> to vector<8x128xf32>
    %192 = arith.subf %186, %191 : vector<8x128xf32>
    %193 = arith.mulf %192, %192 : vector<8x128xf32>
    %cst_82 = arith.constant dense<0.000000e+00> : vector<8xf32>
    %194 = vector.multi_reduction <add>, %193, %cst_82 [1] : vector<8x128xf32> to vector<8xf32>
    %195 = vector.shape_cast %194 : vector<8xf32> to vector<8x1xf32>
    %cst_83 = arith.constant 1.280000e+02 : f32
    %196 = vector.broadcast %cst_83 : f32 to vector<8x1xf32>
    %197 = arith.divf %195, %196 : vector<8x1xf32>
    %198 = vector.broadcast %190 : vector<8x1xf32> to vector<8x128xf32>
    %199 = arith.subf %186, %198 : vector<8x128xf32>
    %cst_84 = arith.constant 9.99999996E-13 : f32
    %200 = vector.broadcast %cst_84 : f32 to vector<8x1xf32>
    %201 = arith.addf %197, %200 : vector<8x1xf32>
    %202 = math.rsqrt %201 : vector<8x1xf32>
    %203 = vector.broadcast %202 : vector<8x1xf32> to vector<8x128xf32>
    %204 = arith.mulf %199, %203 : vector<8x128xf32>
    %205 = vector.broadcast %17 : vector<1x128xf32> to vector<8x128xf32>
    %206 = arith.mulf %205, %204 : vector<8x128xf32>
    %207 = vector.broadcast %18 : vector<1x128xf32> to vector<8x128xf32>
    %208 = arith.addf %206, %207 : vector<8x128xf32>
    %209 = arith.truncf %208 : vector<8x128xf32> to vector<8x128xbf16>
    %c0_85 = arith.constant 0 : index
    %c0_86 = arith.constant 0 : index
    %c0_87 = arith.constant 0 : index
    %210 = vector.load %arg8[%c0_85, %c0_86, %c0_87] : memref<1x128x256xbf16, #tpu.memory_space<vmem>>, vector<1x128x256xbf16>
    %211 = vector.shape_cast %210 : vector<1x128x256xbf16> to vector<128x256xbf16>
    %cst_88 = arith.constant dense<0.000000e+00> : vector<8x256xf32>
    %212 = tpu.matmul %209, %211, %cst_88 {dimension_numbers = #tpu.dot_dimension_numbers<[1], [0], [0], [1], [0, 0, 1, 1], [], []>} : vector<8x128xbf16>, vector<128x256xbf16>, vector<8x256xf32> -> vector<8x256xf32>
    %c0_89 = arith.constant 0 : index
    %c0_90 = arith.constant 0 : index
    %c0_91 = arith.constant 0 : index
    %213 = vector.load %arg10[%c0_89, %c0_90, %c0_91] : memref<1x1x256xf32, #tpu.memory_space<vmem>>, vector<1x1x256xf32>
    %214 = vector.shape_cast %213 : vector<1x1x256xf32> to vector<1x256xf32>
    %215 = vector.broadcast %214 : vector<1x256xf32> to vector<8x256xf32>
    %216 = arith.addf %212, %215 : vector<8x256xf32>
    %cst_92 = arith.constant 0.000000e+00 : f32
    %217 = vector.broadcast %cst_92 : f32 to vector<8x256xf32>
    %218 = arith.maximumf %216, %217 : vector<8x256xf32>
    %219 = arith.truncf %218 : vector<8x256xf32> to vector<8x256xbf16>
    %c0_93 = arith.constant 0 : index
    %c0_94 = arith.constant 0 : index
    %c0_95 = arith.constant 0 : index
    %220 = vector.load %arg9[%c0_93, %c0_94, %c0_95] : memref<1x256x128xbf16, #tpu.memory_space<vmem>>, vector<1x256x128xbf16>
    %221 = vector.shape_cast %220 : vector<1x256x128xbf16> to vector<256x128xbf16>
    %cst_96 = arith.constant dense<0.000000e+00> : vector<8x128xf32>
    %222 = tpu.matmul %219, %221, %cst_96 {dimension_numbers = #tpu.dot_dimension_numbers<[1], [0], [0], [1], [0, 0, 1, 1], [], []>} : vector<8x256xbf16>, vector<256x128xbf16>, vector<8x128xf32> -> vector<8x128xf32>
    %223 = vector.broadcast %23 : vector<1x128xf32> to vector<8x128xf32>
    %224 = arith.addf %222, %223 : vector<8x128xf32>
    %225 = arith.addf %224, %208 : vector<8x128xf32>
    %cst_97 = arith.constant dense<0.000000e+00> : vector<8xf32>
    %226 = vector.multi_reduction <add>, %225, %cst_97 [1] : vector<8x128xf32> to vector<8xf32>
    %227 = vector.shape_cast %226 : vector<8xf32> to vector<8x1xf32>
    %cst_98 = arith.constant 1.280000e+02 : f32
    %228 = vector.broadcast %cst_98 : f32 to vector<8x1xf32>
    %229 = arith.divf %227, %228 : vector<8x1xf32>
    %230 = vector.broadcast %229 : vector<8x1xf32> to vector<8x128xf32>
    %231 = arith.subf %225, %230 : vector<8x128xf32>
    %232 = arith.mulf %231, %231 : vector<8x128xf32>
    %cst_99 = arith.constant dense<0.000000e+00> : vector<8xf32>
    %233 = vector.multi_reduction <add>, %232, %cst_99 [1] : vector<8x128xf32> to vector<8xf32>
    %234 = vector.shape_cast %233 : vector<8xf32> to vector<8x1xf32>
    %cst_100 = arith.constant 1.280000e+02 : f32
    %235 = vector.broadcast %cst_100 : f32 to vector<8x1xf32>
    %236 = arith.divf %234, %235 : vector<8x1xf32>
    %237 = vector.broadcast %229 : vector<8x1xf32> to vector<8x128xf32>
    %238 = arith.subf %225, %237 : vector<8x128xf32>
    %cst_101 = arith.constant 9.99999996E-13 : f32
    %239 = vector.broadcast %cst_101 : f32 to vector<8x1xf32>
    %240 = arith.addf %236, %239 : vector<8x1xf32>
    %241 = math.rsqrt %240 : vector<8x1xf32>
    %242 = vector.broadcast %241 : vector<8x1xf32> to vector<8x128xf32>
    %243 = arith.mulf %238, %242 : vector<8x128xf32>
    %244 = vector.broadcast %19 : vector<1x128xf32> to vector<8x128xf32>
    %245 = arith.mulf %244, %243 : vector<8x128xf32>
    %246 = vector.broadcast %20 : vector<1x128xf32> to vector<8x128xf32>
    %247 = arith.addf %245, %246 : vector<8x128xf32>
    %c0_102 = arith.constant 0 : index
    %c0_103 = arith.constant 0 : index
    %248 = vector.load %arg15[%c0_102, %c0_103] : memref<8x128xf32, #tpu.memory_space<vmem>>, vector<8x128xf32>
    tpu.vector_store %arg15[%c0_102, %c0_103], %247 {strides = array<i32>} : memref<8x128xf32, #tpu.memory_space<vmem>>, vector<8x128xf32>,
    %c1_i32 = arith.constant 1 : i32
    %249 = arith.cmpi eq, %arg1, %c1_i32 : i32
    %250 = arith.extui %249 : i1 to i32
    %c0_i32_104 = arith.constant 0 : i32
    %251 = arith.cmpi ne, %250, %c0_i32_104 : i32
    scf.if %251 {
      %252 = arith.truncf %247 : vector<8x128xf32> to vector<8x128xbf16>
      %c0_105 = arith.constant 0 : index
      %c0_106 = arith.constant 0 : index
      %253 = vector.load %arg12[%c0_105, %c0_106] : memref<128x128xbf16, #tpu.memory_space<vmem>>, vector<128x128xbf16>
      %cst_107 = arith.constant dense<0.000000e+00> : vector<8x128xf32>
      %254 = tpu.matmul %252, %253, %cst_107 {dimension_numbers = #tpu.dot_dimension_numbers<[1], [0], [0], [1], [0, 0, 1, 1], [], []>} : vector<8x128xbf16>, vector<128x128xbf16>, vector<8x128xf32> -> vector<8x128xf32>
      %c0_108 = arith.constant 0 : index
      %c0_109 = arith.constant 0 : index
      %255 = vector.load %arg13[%c0_108, %c0_109] : memref<1x128xf32, #tpu.memory_space<vmem>>, vector<1x128xf32>
      %256 = vector.broadcast %255 : vector<1x128xf32> to vector<8x128xf32>
      %257 = arith.addf %254, %256 : vector<8x128xf32>
      %c0_110 = arith.constant 0 : index
      %c0_111 = arith.constant 0 : index
      %c0_112 = arith.constant 0 : index
      %258 = vector.load %arg14[%c0_110, %c0_111, %c0_112] : memref<1x8x128xf32, #tpu.memory_space<vmem>>, vector<1x8x128xf32>
      %259 = vector.shape_cast %258 : vector<1x8x128xf32> to vector<8x128xf32>
      %260 = vector.shape_cast %257 : vector<8x128xf32> to vector<1x8x128xf32>
      tpu.vector_store %arg14[%c0_110, %c0_111, %c0_112], %260 {strides = array<i32>} : memref<1x8x128xf32, #tpu.memory_space<vmem>>, vector<1x8x128xf32>,
    } else {
    }
    return
  }
  func.func @transform_0(%arg0: i32, %arg1: i32) -> (i32, i32, i32) {
    %c0_i32 = arith.constant 0 : i32
    %c0_i32_0 = arith.constant 0 : i32
    %c0_i32_1 = arith.constant 0 : i32
    return %arg0, %c0_i32, %c0_i32_0 : i32, i32, i32
  }
  func.func @transform_1(%arg0: i32, %arg1: i32) -> (i32, i32, i32) {
    %c0_i32 = arith.constant 0 : i32
    %c0_i32_0 = arith.constant 0 : i32
    %c0_i32_1 = arith.constant 0 : i32
    return %arg0, %c0_i32, %c0_i32_0 : i32, i32, i32
  }
  func.func @transform_2(%arg0: i32, %arg1: i32) -> (i32, i32, i32, i32) {
    %c0_i32 = arith.constant 0 : i32
    %c0_i32_0 = arith.constant 0 : i32
    %c0_i32_1 = arith.constant 0 : i32
    %c0_i32_2 = arith.constant 0 : i32
    return %arg0, %c0_i32, %c0_i32_0, %c0_i32_1 : i32, i32, i32, i32
  }
  func.func @transform_3(%arg0: i32, %arg1: i32) -> (i32, i32, i32, i32) {
    %c0_i32 = arith.constant 0 : i32
    %c0_i32_0 = arith.constant 0 : i32
    %c0_i32_1 = arith.constant 0 : i32
    %c0_i32_2 = arith.constant 0 : i32
    return %arg0, %c0_i32, %c0_i32_0, %c0_i32_1 : i32, i32, i32, i32
  }
  func.func @transform_4(%arg0: i32, %arg1: i32) -> (i32, i32, i32, i32, i32) {
    %c0_i32 = arith.constant 0 : i32
    %c0_i32_0 = arith.constant 0 : i32
    %c0_i32_1 = arith.constant 0 : i32
    %c0_i32_2 = arith.constant 0 : i32
    %c0_i32_3 = arith.constant 0 : i32
    return %arg1, %c0_i32, %c0_i32_0, %c0_i32_1, %c0_i32_2 : i32, i32, i32, i32, i32
  }
  func.func @transform_5(%arg0: i32, %arg1: i32) -> (i32, i32, i32, i32, i32) {
    %c0_i32 = arith.constant 0 : i32
    %c0_i32_0 = arith.constant 0 : i32
    %c0_i32_1 = arith.constant 0 : i32
    %c0_i32_2 = arith.constant 0 : i32
    %c0_i32_3 = arith.constant 0 : i32
    return %arg1, %c0_i32, %c0_i32_0, %c0_i32_1, %c0_i32_2 : i32, i32, i32, i32, i32
  }
  func.func @transform_6(%arg0: i32, %arg1: i32) -> (i32, i32, i32) {
    %c0_i32 = arith.constant 0 : i32
    %c0_i32_0 = arith.constant 0 : i32
    %c0_i32_1 = arith.constant 0 : i32
    return %arg1, %c0_i32, %c0_i32_0 : i32, i32, i32
  }
  func.func @transform_7(%arg0: i32, %arg1: i32) -> (i32, i32, i32) {
    %c0_i32 = arith.constant 0 : i32
    %c0_i32_0 = arith.constant 0 : i32
    %c0_i32_1 = arith.constant 0 : i32
    return %arg1, %c0_i32, %c0_i32_0 : i32, i32, i32
  }
  func.func @transform_8(%arg0: i32, %arg1: i32) -> (i32, i32, i32) {
    %c0_i32 = arith.constant 0 : i32
    %c0_i32_0 = arith.constant 0 : i32
    %c0_i32_1 = arith.constant 0 : i32
    return %arg1, %c0_i32, %c0_i32_0 : i32, i32, i32
  }
  func.func @transform_9(%arg0: i32, %arg1: i32) -> (i32, i32, i32) {
    %c0_i32 = arith.constant 0 : i32
    %c0_i32_0 = arith.constant 0 : i32
    %c0_i32_1 = arith.constant 0 : i32
    return %arg1, %c0_i32, %c0_i32_0 : i32, i32, i32
  }
  func.func @transform_10(%arg0: i32, %arg1: i32) -> (i32, i32) {
    %c0_i32 = arith.constant 0 : i32
    %c0_i32_0 = arith.constant 0 : i32
    %c0_i32_1 = arith.constant 0 : i32
    return %c0_i32, %c0_i32_0 : i32, i32
  }
  func.func @transform_11(%arg0: i32, %arg1: i32) -> (i32, i32) {
    %c0_i32 = arith.constant 0 : i32
    %c0_i32_0 = arith.constant 0 : i32
    %c0_i32_1 = arith.constant 0 : i32
    return %c0_i32, %c0_i32_0 : i32, i32
  }
  func.func @transform_12(%arg0: i32, %arg1: i32) -> (i32, i32, i32) {
    %c0_i32 = arith.constant 0 : i32
    %c0_i32_0 = arith.constant 0 : i32
    %c0_i32_1 = arith.constant 0 : i32
    return %arg0, %c0_i32, %c0_i32_0 : i32, i32, i32
  }
}

</mosaic_0001>

<bundles_post_ra>
// kernel: tpu_custom_call.1
= control target key start
LH: loop header
LB: loop body
LE: loop exit
PB: predicated region body
PF: predicated region fallthrough
CT: control target
= control target key end

     0   :  { %s6896_s0 = inlined_call_operand.vmem [shape: f32[2,8,128], index: 0, kind: input, shape index: {}]   ;;  %s6897_s1 = inlined_call_operand.hbm [shape: f32[2,8,128], index: 1, kind: input, shape index: {}]   ;;  %s6898_s2 = inlined_call_operand.hbm [shape: f32[2,1,8,8], index: 2, kind: input, shape index: {}]   ;;  %s6899_s3 = inlined_call_operand.vmem [shape: f32[2,1,1,8], index: 3, kind: input, shape index: {}]   ;;  %s6900_s4 = inlined_call_operand.hbm [shape: bf16[2,8,4,32,128], index: 4, kind: input, shape index: {}]   ;;  %s6901_s5 = inlined_call_operand.hbm [shape: f32[2,6,4,1,32], index: 5, kind: input, shape index: {}]   ;;  %s6902_s6 = inlined_call_operand.hbm [shape: bf16[2,128,256], index: 6, kind: input, shape index: {}]   ;;  %s6903_s7 = inlined_call_operand.hbm [shape: bf16[2,256,128], index: 7, kind: input, shape index: {}]   ;;  %s6904_s8 = inlined_call_operand.vmem [shape: f32[2,1,256], index: 8, kind: input, shape index: {}]   ;;  %s6905_s9 = inlined_call_operand.vmem [shape: f32[2,9,128], index: 9, kind: input, shape index: {}]   ;;  %s6906_s10 = inlined_call_operand.vmem [shape: bf16[128,128], index: 10, kind: input, shape index: {}]   ;;  %s6907_s11 = inlined_call_operand.vmem [shape: f32[1,128], index: 11, kind: input, shape index: {}]   ;;  %s6908_s12 = inlined_call_operand.hbm [shape: f32[2,8,128], index: 12, kind: output, shape index: {}]  }
   0x1   :  { %6940 = sst [smem:[#allocation37_spill]] %s6896_s0 }
   0x2   :  { %6941 = sst [smem:[#allocation38_spill]] %s6897_s1 }
   0x3   :  { %6942 = sst [smem:[#allocation39_spill]] %s6898_s2 }
   0x4   :  { %6943 = sst [smem:[#allocation40_spill]] %s6899_s3 }
   0x5   :  { %6944 = sst [smem:[#allocation41_spill]] %s6900_s4 }
   0x6   :  { %6945 = sst [smem:[#allocation42_spill]] %s6901_s5 }
   0x7   :  { %6946 = sst [smem:[#allocation43_spill]] %s6902_s6 }
   0x8   :  { %6947 = sst [smem:[#allocation44_spill]] %s6903_s7 }
   0x9   :  { %6948 = sst [smem:[#allocation45_spill]] %s6904_s8 }
   0xa   :  { %6949 = sst [smem:[#allocation46_spill]] %s6905_s9 }
   0xb   :  { %6950 = sst [smem:[#allocation47_spill]] %s6906_s10 }
   0xc   :  { %6951 = sst [smem:[#allocation48_spill]] %s6907_s11 }
   0xd   :  { %6952 = sst [smem:[#allocation49_spill]] %s6908_s12 }
   0xe   :  { %17 = vsyncpa [#allocation4], 0 }
   0xf   :  { %19 = vsyncpa [#allocation4 + $0x1], 0 }
  0x10   :  { %20 = vsyncpa [#allocation7], 0 }
  0x11   :  { %22 = vsyncpa [#allocation7 + $0x1], 0 }
  0x12   :  { %23 = vsyncpa [#allocation10], 0 }
  0x13   :  { %25 = vsyncpa [#allocation10 + $0x1], 0 }
  0x14   :  { %26 = vsyncpa [#allocation13], 0 }
  0x15   :  { %28 = vsyncpa [#allocation13 + $0x1], 0 }
  0x16   :  { %29 = vsyncpa [#allocation5], 0 }
  0x17   :  { %31 = vsyncpa [#allocation5 + $0x1], 0  ;;  %s5908_s21 = smov 0   ;;  %s5910_s22 = smov 0  }
  0x18   :  { %s5912_s23 = smov 0   ;;  %s5914_s24 = smov 0  }
  0x19   :  { %s5916_s25 = smov 0   ;;  %s5918_s26 = smov 0  }
  0x1a   :  { %s5920_s27 = smov 0   ;;  %s5922_s28 = smov 0  }
  0x1b   :  { %s5924_s29 = smov 0   ;;  %s5926_s30 = smov 0  }
  0x1c   :  { %s5928_s13 = smov 0  }
  0x1d LB: > { %6953 = sst [smem:[#allocation21_spill]] %s5787_s22  ;;  %s5964_s14 = sadd.s32 4294967295, %s5823_s13   ;;  %s5823_s13 = sphi %s5928_s13, %s37_s13   ;;  %s5819_s30 = sphi %s5926_s30, %s7028_s30   ;;  %s5815_s29 = sphi %s5924_s29, %s7027_s29   ;;  %s5811_s28 = sphi %s5922_s28, %s7026_s28   ;;  %s5807_s27 = sphi %s5920_s27, %s7025_s27   ;;  %s5803_s26 = sphi %s5918_s26, %s7031_s26   ;;  %s5799_s25 = sphi %s5916_s25, %s7030_s25   ;;  %s5795_s24 = sphi %s5914_s24, %s7029_s24   ;;  %s5791_s23 = sphi %s5912_s23, %s7023_s23   ;;  %s5787_s22 = sphi %s5910_s22, %s7022_s22   ;;  %s5783_s21 = sphi %s5908_s21, %s7021_s21  }
  0x1e   : > { %6954 = sst [smem:[#allocation22_spill]] %s5791_s23  ;;  %s4377_s15 = sadd.s32 4294967294, %s5823_s13  }
  0x1f   : > { %6955 = sst [smem:[#allocation23_spill]] %s5795_s24  ;;  %s46_s16 = sadd.s32 1, %s5815_s29 }
  0x20   : > { %6956 = sst [smem:[#allocation24_spill]] %s5807_s27  ;;  %s49_s17 = sadd.s32 1, %s5819_s30 }
  0x21   : > { %6957 = sst [smem:[#allocation25_spill]] %s5811_s28  ;;  %p47_p0 = scmp.ge.s32.totalorder %s46_s16, 2 }
  0x22   : > { %6958 = sst [smem:[#allocation26_spill]] %s5815_s29  ;;  %s82_s18 = sadd.s32 1, %s5803_s26 }
  0x23   : > { %6959 = sst [smem:[#allocation27_spill]] %s5819_s30  ;;  %p89_p1 = scmp.ne.s32.totalorder %s5803_s26, %s5799_s25 }
  0x24   : > { %6960 = sst [smem:[#allocation28_spill]] %s5823_s13  ;;  %p90_p2 = scmp.eq.s32.totalorder %s5823_s13, 0 }
  0x25   : > { %6961 = sst [smem:[#allocation29_spill]] %s5964_s14  ;;  %s7033_s16 = smov (%p47_p0, %s46_s16), 0 }
  0x26   : > { %6962 = sst [smem:[#allocation30_spill]] %s7033_s16  ;;  %s7035_s17 = smov (!%p47_p0, %s49_s17), %s5819_s30 }
  0x27   : > { %p5981_p3 = por %p90_p2, %p89_p1  ;;  %p6912_p4 = scmp.ne.s32.totalorder %s5799_s25, %s5795_s24 }
  0x28   : > { %p51_p5 = scmp.ge.s32.totalorder %s7035_s17, 2  ;;  %p96_p6 = scmp.eq.s32.totalorder %s5964_s14, 0 }
  0x29   : > { %s157_s20 = ssub.s32 %s5815_s29, %s7033_s16  ;;  %s160_s12 = sadd.s32 1, %s5791_s23 }
  0x2a   : > { %s7037_s17 = smov (%p51_p5, %s7035_s17), 0  ;;  %p5998_p7 = por %p96_p6, %p6912_p4 }
  0x2b   : > { %6964 = sst [smem:[#allocation31_spill]] %s7037_s17  ;;  %p158_p8 = scmp.eq.s32.totalorder %s157_s20, 0 }
  0x2c   : > { %s6965_s11 = scalar_select %p5998_p7, 1, 0 }
  0x2d   : > { %s79_s10 = ssub.s32 %s5819_s30, %s7037_s17  ;;  %p167_p9 = scmp.ne.s32.totalorder %s5791_s23, %s5787_s22 }
  0x2e   : > { %p80_p10 = scmp.eq.s32.totalorder %s79_s10, 0  ;;  %p173_p11 = scmp.ne.s32.totalorder %s5787_s22, %s5783_s21 }
  0x2f   : > { %s6009_s16 = scalar_select %p158_p8, %s5791_s23, %s160_s12  }
  0x30   : > { %s6012_s9 = scalar_select %p80_p10, %s5803_s26, %s82_s18  }
  0x31   : > { %6966 = sst [smem:[#allocation32_spill]] %s6009_s16  ;;  %p6016_p12 = por %p167_p9, %p90_p2 }
  0x32   : > { %6967 = sst [smem:[#allocation33_spill]] %s6012_s9  ;;  %p6022_p13 = por %p173_p11, %p96_p6 }
  0x33   : > { %p369_p0 = scmp.eq.s32.totalorder %s5964_s14, 3  ;;  %p375_p5 = scmp.eq.s32.totalorder %s4377_s15, 3 }
  0x34   : > { %s6969_s20 = scalar_select %p6022_p13, 1, 0 }
  0x35   : > { %p5252_p4 = scmp.lt.s32.totalorder %s5823_s13, 4  ;;  %p6031_p8 = por %p369_p0, %p89_p1 }
  0x36   : > { %6970 = sst [smem:[#allocation34_spill]] %s6969_s20  ;;  %p6973_p10 = scmp.ne.s32.totalorder %s5799_s25, %s5795_s24 }
  0x37   : > { %s6971_s10 = scalar_select %p6031_p8, 1, 0 }
  0x38   : > { %p6038_p2 = por %p375_p5, %p6973_p10  ;;  %s6917_s21 = sand.u32 1, %s5803_s26  }
  0x39   : > { %6972 = sst [smem:[#allocation35_spill]] %s6971_s10  ;;  %s6919_s18 = sshll.u32 %s5819_s30, 7 }
  0x3a   : > { %s6974_s12 = scalar_select %p6038_p2, 1, 0 }
  0x3b   : > { %s6046_s17 = sshll.u32 %s6917_s21, 3  ;;  %p6050_p6 = pnand %p5252_p4, %p5981_p3 }
  0x3c   : > { %6975 = sst [smem:[#allocation36_spill]] %s6974_s12  ;;  %s6921_s9 = sand.u32 1, %s5823_s13  }
  0x3d   : > { %s6976_s15 = scalar_select %p6050_p6, 1, 0 }
  0x3e   : > { %s6977_s2 = sld [smem:[#allocation39_spill]]  ;;  %s430_s21 = scalar_lea.vmem [#allocation6], %s6046_s17 }
  0x3f   : > { %s437_s19 = sshll.u32 %s430_s21, 4  ;;  %p6067_p1 = pnand %p5252_p4, %p6016_p12  ;;  %s6063_s19 = int_to_ptr.vmem [resolvable:$true] %s437_s19 }
  0x40   : > { %s6073_s0 = scalar_lea.sflag [#allocation7], %s6921_s9  ;;  %p6927_p9 = pneg %p6050_p6 }
  0x41   : > { %s6978_s12 = scalar_select %p6067_p1, 1, 0 }
  0x44   : > { %s6060_s10 = scalar_lea.hbm %s6977_s2, %s6919_s18  ;;  %s5510_s21 = scalar_lea.hbm %s6977_s2, 256 }
  0x45   : > { %s5505_s3 = scalar_lea.hbm %s6060_s10, 128  ;;  %p5511_p4 = scmp.lt.u32.totalorder %s6060_s10, %s6977_s2 }
  0x46   : > { %p5506_p3 = scmp.ne.s32.totalorder %s6060_s10, %s5505_s3  ;;  %p5512_p12 = scmp.lt.u32.totalorder %s5510_s21, %s5505_s3 }
  0x47   : > { %p5514_p10 = scmp.lt.u32.totalorder %s5505_s3, %s6060_s10 }
  0x48   : > { %p5508_p11 = pnand %p6927_p9, %p5506_p3  ;;  %p5513_p5 = por %p5512_p12, %p5511_p4 }
  0x4a   : > { %p5509_p0 = pneg %p5508_p11  ;;  %p5515_p2 = por %p5514_p10, %p5513_p5 }
  0x4c   : > { %p5516_p8 = pnand %p5515_p2, %p5509_p0 }
  0x4e   : > { %5519 = shalt.err (!%p5516_p8)
}
  0x4f   : > { %s5520_s9 = scalar_lea.vmem %s6063_s19, 128  ;;  %s5825_s24 = smov [#allocation6]  }
  0x50   : > { %p5521_p3 = scmp.ne.s32.totalorder %s6063_s19, %s5520_s9  ;;  %s5525_s16 = sshll.u32 %s5825_s24, 4  ;;  %s5526_s16 = int_to_ptr.vmem [resolvable:$false] %s5525_s16 }
  0x51   : > { %s5527_s18 = scalar_lea.vmem %s5526_s16, 256  ;;  %p5528_p7 = scmp.lt.s32.totalorder %s6063_s19, %s5526_s16 }
  0x52   : > { %p5523_p11 = pnand %p5521_p3, %p6927_p9  ;;  %p5529_p4 = scmp.lt.s32.totalorder %s5527_s18, %s5520_s9 }
  0x54   : > { %p5524_p13 = pneg %p5523_p11  ;;  %p5530_p12 = por %p5529_p4, %p5528_p7 }
  0x56   : > { %p5531_p5 = pnand %p5530_p12, %p5524_p13 }
  0x58   : > { %5534 = shalt.err (!%p5531_p5)
}
  0x59   : > { %5235 = dma.hbm_to_vmem [thread:$0]  (!%p6050_p6), %s6060_s10, 128, %s6063_s19, %s6073_s0  }
  0x5a   : > { %p4394_p8 = scmp.ge.s32.totalorder %s5823_s13, 1  ;;  %p547_p2 = scmp.lt.s32.totalorder %s5823_s13, 5 }
  0x5b   : > { %s6104_s3 = sand.u32 1, %s5791_s23   ;;  %s5213_s9 = smul.u32 384, %s5815_s29 }
  0x5c   : > { %p6107_p7 = pnand %p4394_p8, %p547_p2  ;;  %s5212_s8 = smul.u32 24, %s6104_s3 }
  0x5d   : > { %s6980_s5 = sld [smem:[#allocation42_spill]]  ;;  %s6981_s2 = sand.u32 1, %s5823_s13  }
  0x5e   : > { %s6979_s21 = scalar_select %p6107_p7, 1, 0 }
  0x5f   : > { %s475_s10 = scalar_lea.vmem [#allocation9], %s5212_s8  ;;  %s6121_s23 = scalar_lea.sflag [#allocation10], %s6981_s2 }
  0x60   : > { %s482_s19 = sshll.u32 %s475_s10, 4  ;;  %p6127_p0 = pneg %p6067_p1  ;;  %s6117_s19 = int_to_ptr.vmem [resolvable:$true] %s482_s19 }
  0x63   : > { %s6115_s18 = scalar_lea.hbm %s6980_s5, %s5213_s9  ;;  %s5540_s8 = scalar_lea.hbm %s6980_s5, 768 }
  0x64   : > { %s5535_s27 = scalar_lea.hbm %s6115_s18, 384  ;;  %p5541_p11 = scmp.lt.u32.totalorder %s6115_s18, %s6980_s5 }
  0x65   : > { %p5536_p13 = scmp.ne.s32.totalorder %s6115_s18, %s5535_s27  ;;  %p5542_p4 = scmp.lt.u32.totalorder %s5540_s8, %s5535_s27 }
  0x66   : > { %p5544_p5 = scmp.lt.u32.totalorder %s5535_s27, %s6115_s18 }
  0x67   : > { %p5538_p10 = pnand %p6127_p0, %p5536_p13  ;;  %p5543_p12 = por %p5542_p4, %p5541_p11 }
  0x69   : > { %p5539_p3 = pneg %p5538_p10  ;;  %p5545_p8 = por %p5544_p5, %p5543_p12 }
  0x6b   : > { %p5546_p2 = pnand %p5545_p8, %p5539_p3 }
  0x6d   : > { %5549 = shalt.err (!%p5546_p2)
}
  0x6e   : > { %s5550_s2 = scalar_lea.vmem %s6117_s19, 384  ;;  %s5826_s9 = smov [#allocation9]  }
  0x6f   : > { %p5551_p13 = scmp.ne.s32.totalorder %s6117_s19, %s5550_s2  ;;  %s5555_s24 = sshll.u32 %s5826_s9, 4  ;;  %s5556_s24 = int_to_ptr.vmem [resolvable:$false] %s5555_s24 }
  0x70   : > { %s5557_s16 = scalar_lea.vmem %s5556_s24, 768  ;;  %p5558_p7 = scmp.lt.s32.totalorder %s6117_s19, %s5556_s24 }
  0x71   : > { %p5553_p10 = pnand %p5551_p13, %p6127_p0  ;;  %p5559_p6 = scmp.lt.s32.totalorder %s5557_s16, %s5550_s2 }
  0x73   : > { %p5554_p9 = pneg %p5553_p10  ;;  %p5560_p11 = por %p5559_p6, %p5558_p7 }
  0x75   : > { %p5561_p4 = pnand %p5560_p11, %p5554_p9 }
  0x77   : > { %5564 = shalt.err (!%p5561_p4)
}
  0x78   : > { %s5827_s27 = smov 16   ;;  %s5828_s8 = smov 1  }
  0x79   : > { %5241 = dma.hbm_to_vmem [thread:$0]  (!%p6067_p1), %s6115_s18, 384, %s6117_s19, %s6121_s23, %s5827_s27, %s5827_s27, %s5828_s8  }
  0x7a   : > { %s6983_s10 = sshll.u32 %s5819_s30, 7  ;;  %s6984_s1 = sld [smem:[#allocation38_spill]] }
  0x7b   : > { %s412_s16 = scalar_lea.vmem [#allocation3], %s6046_s17  ;;  %s4384_s13 = sshll.u32 %s6104_s3, 9 }
  0x7c   : > { %s419_s5 = sshll.u32 %s412_s16, 4  ;;  %s6985_s20 = sand.u32 1, %s5803_s26   ;;  %s6159_s5 = int_to_ptr.vmem [resolvable:$true] %s419_s5 }
  0x7d   : > { %s409_s22 = scalar_lea.sflag [#allocation4], %s6985_s20  ;;  %p6986_p9 = scmp.ne.s32.totalorder %s6976_s15, 0 }
  0x7f   : > { %p6987_p7 = pneg %p6986_p9 }
  0x80   : > { %s6156_s2 = scalar_lea.hbm %s6984_s1, %s6983_s10  ;;  %s5570_s27 = scalar_lea.hbm %s6984_s1, 256 }
  0x81   : > { %s5565_s14 = scalar_lea.hbm %s6156_s2, 128  ;;  %p5571_p5 = scmp.lt.u32.totalorder %s6156_s2, %s6984_s1 }
  0x82   : > { %p5566_p6 = scmp.ne.s32.totalorder %s6156_s2, %s5565_s14  ;;  %p5572_p8 = scmp.lt.u32.totalorder %s5570_s27, %s5565_s14 }
  0x83   : > { %p5574_p13 = scmp.lt.u32.totalorder %s5565_s14, %s6156_s2 }
  0x84   : > { %p5568_p3 = pnand %p5566_p6, %p6987_p7  ;;  %p5573_p2 = por %p5572_p8, %p5571_p5 }
  0x86   : > { %p5569_p12 = pneg %p5568_p3  ;;  %p5575_p10 = por %p5574_p13, %p5573_p2 }
  0x88   : > { %p5576_p11 = pnand %p5575_p10, %p5569_p12 }
  0x8a   : > { %5579 = shalt.err (!%p5576_p11)
}
  0x8b   : > { %s5580_s17 = scalar_lea.vmem %s6159_s5, 128  ;;  %p6988_p6 = pmov %p6987_p7 }
  0x8c   : > { %p5581_p4 = scmp.ne.s32.totalorder %s6159_s5, %s5580_s17  ;;  %s5829_s20 = smov [#allocation3]  }
  0x8d   : > { %s5585_s9 = sshll.u32 %s5829_s20, 4  ;;  %s5586_s9 = int_to_ptr.vmem [resolvable:$false] %s5585_s9 }
  0x8e   : > { %p5583_p7 = pnand %p5581_p4, %p6988_p6  ;;  %s5587_s24 = scalar_lea.vmem %s5586_s9, 256 }
  0x8f   : > { %p5588_p1 = scmp.lt.s32.totalorder %s6159_s5, %s5586_s9  ;;  %p5589_p5 = scmp.lt.s32.totalorder %s5587_s24, %s5580_s17 }
  0x90   : > { %p5584_p3 = pneg %p5583_p7 }
  0x91   : > { %p5590_p8 = por %p5589_p5, %p5588_p1 }
  0x93   : > { %p5591_p2 = pnand %p5590_p8, %p5584_p3 }
  0x95   : > { %5594 = shalt.err (!%p5591_p2)
}
  0x96   : > { %5232 = dma.hbm_to_vmem [thread:$0]  (!%p6986_p9), %s6156_s2, 128, %s6159_s5, %s409_s22  }
  0x97   : > { %s4677_s14 = sshll.u32 %s5815_s29, 13  ;;  %s6989_s4 = sld [smem:[#allocation41_spill]] }
  0x98   : > { %s454_s27 = scalar_lea.vmem [#allocation8], %s4384_s13  ;;  %s4388_s8 = sshll.u32 %s6104_s3, 7 }
  0x99   : > { %s461_s15 = sshll.u32 %s454_s27, 4  ;;  %s6195_s15 = int_to_ptr.vmem [resolvable:$true] %s461_s15 }
  0x9d   : > { %s6191_s19 = scalar_lea.hbm %s6989_s4, %s4677_s14  ;;  %s5600_s2 = scalar_lea.hbm %s6989_s4, 16384 }
  0x9e   : > { %s5595_s10 = scalar_lea.hbm %s6191_s19, 8192  ;;  %p5601_p13 = scmp.lt.u32.totalorder %s6191_s19, %s6989_s4 }
  0x9f   : > { %p5596_p1 = scmp.ne.s32.totalorder %s6191_s19, %s5595_s10  ;;  %p5602_p10 = scmp.lt.u32.totalorder %s5600_s2, %s5595_s10 }
  0xa0   : > { %p5604_p4 = scmp.lt.u32.totalorder %s5595_s10, %s6191_s19 }
  0xa1   : > { %p5598_p9 = pnand %p5596_p1, %p6127_p0  ;;  %p5603_p11 = por %p5602_p10, %p5601_p13 }
  0xa3   : > { %p5599_p12 = pneg %p5598_p9  ;;  %p5605_p6 = por %p5604_p4, %p5603_p11 }
  0xa5   : > { %p5606_p7 = pnand %p5605_p6, %p5599_p12 }
  0xa7   : > { %5609 = shalt.err (!%p5606_p7)
}
  0xa8   : > { %s5610_s13 = scalar_lea.vmem %s6195_s15, 8192  ;;  %s5830_s9 = smov [#allocation8]  }
  0xa9   : > { %p5611_p3 = scmp.ne.s32.totalorder %s6195_s15, %s5610_s13  ;;  %s5615_s24 = sshll.u32 %s5830_s9, 4  ;;  %s5616_s24 = int_to_ptr.vmem [resolvable:$false] %s5615_s24 }
  0xaa   : > { %s5617_s14 = scalar_lea.vmem %s5616_s24, 16384  ;;  %p5618_p2 = scmp.lt.s32.totalorder %s6195_s15, %s5616_s24 }
  0xab   : > { %p5613_p5 = pnand %p5611_p3, %p6127_p0  ;;  %p5619_p1 = scmp.lt.s32.totalorder %s5617_s14, %s5610_s13 }
  0xad   : > { %p5614_p8 = pneg %p5613_p5  ;;  %p5620_p9 = por %p5619_p1, %p5618_p2 }
  0xaf   : > { %p5621_p13 = pnand %p5620_p9, %p5614_p8 }
  0xb1   : > { %5624 = shalt.err (!%p5621_p13)
}
  0xb2   : > { %s5831_s16 = smov 64   ;;  %s5832_s18 = smov 4  }
  0xb3   : > { %p6990_p12 = scmp.ne.s32.totalorder %s6978_s12, 0  ;;  %s4678_s27 = sshll.u32 %s5815_s29, 11 }
  0xb4   : > { %s6991_s6 = sld [smem:[#allocation43_spill]]  ;;  %s496_s2 = scalar_lea.vmem [#allocation11], %s4388_s8 }
  0xb5   : > { %5238 = dma.hbm_to_vmem [thread:$0]  (!%p6990_p12), %s6191_s19, 8192, %s6195_s15, %s6073_s0, %s5831_s16, %s5831_s16, %s5832_s18  }
  0xb6   : > { %s503_s17 = sshll.u32 %s496_s2, 4  ;;  %s6233_s17 = int_to_ptr.vmem [resolvable:$true] %s503_s17 }
  0xba   : > { %s6229_s22 = scalar_lea.hbm %s6991_s6, %s4678_s27  ;;  %s5630_s15 = scalar_lea.hbm %s6991_s6, 4096 }
  0xbb   : > { %s5625_s20 = scalar_lea.hbm %s6229_s22, 2048  ;;  %p5631_p6 = scmp.lt.u32.totalorder %s6229_s22, %s6991_s6 }
  0xbc   : > { %p5626_p10 = scmp.ne.s32.totalorder %s6229_s22, %s5625_s20  ;;  %p5632_p7 = scmp.lt.u32.totalorder %s5630_s15, %s5625_s20 }
  0xbd   : > { %p5634_p5 = scmp.lt.u32.totalorder %s5625_s20, %s6229_s22 }
  0xbe   : > { %p5628_p11 = pnand %p5626_p10, %p6127_p0  ;;  %p5633_p3 = por %p5632_p7, %p5631_p6 }
  0xc0   : > { %p5629_p4 = pneg %p5628_p11  ;;  %p5635_p8 = por %p5634_p5, %p5633_p3 }
  0xc2   : > { %p5636_p2 = pnand %p5635_p8, %p5629_p4 }
  0xc4   : > { %5639 = shalt.err (!%p5636_p2)
}
  0xc5   : > { %s5640_s24 = scalar_lea.vmem %s6233_s17, 2048  ;;  %s5833_s14 = smov [#allocation11]  }
  0xc6   : > { %p5641_p1 = scmp.ne.s32.totalorder %s6233_s17, %s5640_s24  ;;  %s5645_s10 = sshll.u32 %s5833_s14, 4  ;;  %s5646_s10 = int_to_ptr.vmem [resolvable:$false] %s5645_s10 }
  0xc7   : > { %s5647_s5 = scalar_lea.vmem %s5646_s10, 4096  ;;  %p5648_p10 = scmp.lt.s32.totalorder %s6233_s17, %s5646_s10 }
  0xc8   : > { %p5643_p9 = pnand %p5641_p1, %p6127_p0  ;;  %p5649_p11 = scmp.lt.s32.totalorder %s5647_s5, %s5640_s24 }
  0xca   : > { %p5644_p13 = pneg %p5643_p9  ;;  %p5650_p6 = por %p5649_p11, %p5648_p10 }
  0xcc   : > { %p5651_p7 = pnand %p5650_p6, %p5644_p13 }
  0xce   : > { %5654 = shalt.err (!%p5651_p7)
}
  0xcf   : > { %s5834_s2 = smov 128   ;;  %s5835_s20 = smov 8  }
  0xd0   : > { %5244 = dma.hbm_to_vmem [thread:$0]  (!%p6990_p12), %s6229_s22, 2048, %s6233_s17, %s6121_s23, %s5834_s2, %s5834_s2, %s5835_s20  }
  0xd1   : > { %s6992_s7 = sld [smem:[#allocation44_spill]]  ;;  %s517_s13 = scalar_lea.vmem [#allocation12], %s4388_s8 }
  0xd2   : > { %s524_s9 = sshll.u32 %s517_s13, 4  ;;  %s514_s24 = scalar_lea.sflag [#allocation13], %s6104_s3  ;;  %s6266_s9 = int_to_ptr.vmem [resolvable:$true] %s524_s9 }
  0xd7   : > { %s6262_s15 = scalar_lea.hbm %s6992_s7, %s4678_s27  ;;  %s5660_s27 = scalar_lea.hbm %s6992_s7, 4096 }
  0xd8   : > { %s5655_s14 = scalar_lea.hbm %s6262_s15, 2048  ;;  %p5661_p8 = scmp.lt.u32.totalorder %s6262_s15, %s6992_s7 }
  0xd9   : > { %p5656_p4 = scmp.ne.s32.totalorder %s6262_s15, %s5655_s14  ;;  %p5662_p2 = scmp.lt.u32.totalorder %s5660_s27, %s5655_s14 }
  0xda   : > { %p5664_p9 = scmp.lt.u32.totalorder %s5655_s14, %s6262_s15 }
  0xdb   : > { %p5658_p3 = pnand %p5656_p4, %p6127_p0  ;;  %p5663_p1 = por %p5662_p2, %p5661_p8 }
  0xdd   : > { %p5659_p5 = pneg %p5658_p3  ;;  %p5665_p13 = por %p5664_p9, %p5663_p1 }
  0xdf   : > { %p5666_p10 = pnand %p5665_p13, %p5659_p5 }
  0xe1   : > { %5669 = shalt.err (!%p5666_p10)
}
  0xe2   : > { %s5670_s8 = scalar_lea.vmem %s6266_s9, 2048  ;;  %s5836_s5 = smov [#allocation12]  }
  0xe3   : > { %p5671_p11 = scmp.ne.s32.totalorder %s6266_s9, %s5670_s8  ;;  %s5675_s2 = sshll.u32 %s5836_s5, 4  ;;  %s5676_s2 = int_to_ptr.vmem [resolvable:$false] %s5675_s2 }
  0xe4   : > { %s5677_s20 = scalar_lea.vmem %s5676_s2, 4096  ;;  %p5678_p4 = scmp.lt.s32.totalorder %s6266_s9, %s5676_s2 }
  0xe5   : > { %p5673_p6 = pnand %p5671_p11, %p6127_p0  ;;  %p5679_p3 = scmp.lt.s32.totalorder %s5677_s20, %s5670_s8 }
  0xe7   : > { %p5674_p7 = pneg %p5673_p6  ;;  %p5680_p8 = por %p5679_p3, %p5678_p4 }
  0xe9   : > { %p5681_p2 = pnand %p5680_p8, %p5674_p7 }
  0xeb   : > { %5684 = shalt.err (!%p5681_p2)
}
  0xec   : > { %5247 = dma.hbm_to_vmem [thread:$0]  (!%p6990_p12), %s6262_s15, 2048, %s6266_s9, %s514_s24, %s5831_s16, %s5831_s16, %s5832_s18  }
  0xed   : > { %p6993_p0 = scmp.ne.s32.totalorder %s6979_s21, 0 }
  0xee   : > { %s6298_s28 = sand.u32 (!%p6993_p0), 1, %s5799_s25   ;;  %p6994_p5 = scmp.ne.s32.totalorder (!%p6993_p0), %s6965_s11, 0 }
  0xef   : > { %551 = sbr.rel (%p6993_p0) target bundleno = 4407 (0x1137), region = 68  ;;  %s6301_s0 = sshll.u32 (!%p6993_p0), %s6298_s28, 3 }
  0xf0   : > { %s554_s12 = scalar_lea.sflag (!%p6993_p0), [#allocation4], %s6298_s28 }
  0xf6   : > { %5758 = dma.done.wait (%p6994_p5), %s554_s12, 128  }
  0xf7   : > { %5760 = vsyncadd (%p6994_p5), %s554_s12, 4294967168  ;;  %s6995_s3 = sld [smem:[#allocation29_spill]] }
  0xfd   : > { %s562_s21 = sand.u32 1, %s6995_s3  }
  0xfe   : > { %s563_s16 = scalar_lea.sflag [#allocation7], %s562_s21 }
  0xff   : > { %5762 = dma.done.wait (%p6994_p5), %s563_s16, 128  }
 0x100   : > { %5764 = vsyncadd (%p6994_p5), %s563_s16, 4294967168  ;;  %s6996_s15 = sld [smem:[#allocation21_spill]]  ;;  %s6997_s13 = sld [smem:[#allocation34_spill]] }
 0x106   : > { %s573_s9 = sand.u32 1, %s6996_s15   ;;  %p6998_p12 = scmp.ne.s32.totalorder %s6997_s13, 0 }
 0x107   : > { %s4397_s24 = sshll.u32 %s573_s9, 9 }
 0x108   : > { %s6316_s14 = scalar_lea.vmem [#allocation8], %s4397_s24 }
 0x109   : > { %5766 = dma.done.wait (%p6998_p12), %s563_s16, 8192  }
 0x10a   : > { %5768 = vsyncadd (%p6998_p12), %s563_s16, 4294959104  ;;  %s5214_s23 = smul.u32 24, %s573_s9  ;;  %s581_s22 = scalar_lea.sflag [#allocation10], %s562_s21 }
 0x10c   : > { %s6322_s27 = scalar_lea.vmem [#allocation9], %s5214_s23 }
 0x10d   : > { %5770 = dma.done.wait (%p6998_p12), %s581_s22, 2432  }
 0x10e   : > { %5772 = vsyncadd (%p6998_p12), %s581_s22, 4294964864  ;;  %s4398_s11 = sshll.u32 %s573_s9, 7  ;;  %s599_s10 = scalar_lea.sflag [#allocation13], %s573_s9 }
 0x10f   : > { %s6328_s17 = scalar_lea.vmem [#allocation11], %s4398_s11  ;;  %s6330_s8 = scalar_lea.vmem [#allocation12], %s4398_s11 }
 0x110   : > { %5774 = dma.done.wait (%p6998_p12), %s599_s10, 2048  }
 0x111   : > { %5776 = vsyncadd (%p6998_p12), %s599_s10, 4294965248  ;;  %s6999_s5 = sld [smem:[#allocation25_spill]]  ;;  %s7000_s2 = sld [smem:[#allocation24_spill]] }
 0x112   : > { %s7001_s16 = sld [smem:[#allocation40_spill]]  ;;  %s7002_s24 = sld [smem:[#allocation37_spill]] }
 0x113   : > { %s7003_s19 = sld [smem:[#allocation45_spill]]  ;;  %s7004_s7 = sld [smem:[#allocation46_spill]] }
 0x114   : > { %s683_s29 = scalar_lea.vmem [#allocation14], %s6301_s0 }
 0x117   : > { %p684_p1 = scmp.lt.s32.totalorder %s6999_s5, 1  ;;  %p691_p9 = scmp.lt.s32.totalorder %s7000_s2, 1 }
 0x118   : > { %p4405_p13 = scmp.ne.s32.totalorder %s7000_s2, 0 }
 0x119   : > { %s7039_s5 = smov (!%p684_p1, %s6999_s5), 1 }
 0x11a   : > { %s692_s20 = scalar_select %p691_p9, %s7000_s2, 1 }
 0x11b   : > { %s4401_s12 = sshll.u32 %s7039_s5, 3  ;;  %s690_s15 = scalar_lea.vmem %s7001_s16, %s7039_s5 }
 0x11c   : > { %s687_s23 = scalar_lea.vmem %s7002_s24, %s4401_s12  ;;  %s4402_s22 = sshll.u32 %s692_s20, 1 }
 0x11d   : > { %s6353_s18 = scalar_lea.vmem %s7003_s19, %s4402_s22  ;;  %s4680_s1 = sshll.u32 %s692_s20, 4  ;;  %v705_v0 = vld [vmem:[%s687_s23] sm:$0xff] (!%p4405_p13) }
 0x11e   : > { %s6358_s30 = scalar_lea.vmem %s7004_s7, %s4680_s1  ;;  %704 = sbr.rel (%p4405_p13) target bundleno = 293 (0x125), region = 96  ;;  %706 = vst [vmem:[#allocation2] sm:$0xff] (!%p4405_p13), %v705_v0 }
 0x125 PF: > { %v5353_v1 = vld [vmem:[%s6316_s14] sm:$0xff]   ;;  %v5837_v2 = vmov 0.0   ;;  %v5354_v3 = vld [vmem:[%s6316_s14 + $0x10] sm:$0xff]   ;;  %vm5838_vm0 = vmmov 0   ;;  %v5355_v4 = vld [vmem:[%s6316_s14 + $0x8] sm:$0xff]   ;;  %vm1510_vm1 = vcmask 261120  }
 0x126   : > { %4840 = vmatprep.subr.bf16.mxu0 %v5837_v2  ;;  %4848 = vmatprep.subr.bf16.mxu1 %v5837_v2  ;;  %v5356_v5 = vld [vmem:[%s6316_s14 + $0x18] sm:$0xff]   ;;  %v5357_v8 = vld [vmem:[%s6316_s14 + $0x20] sm:$0xff]   ;;  %v5358_v9 = vld [vmem:[%s6316_s14 + $0x30] sm:$0xff]   ;;  %vm1762_vm2 = vcmask 1043456   ;;  %s7005_s1 = scalar_lea.vmem [#allocation6], %s6301_s0  ;;  %vm1706_vm4 = vcmask 64512  }
 0x127   : > { %4841 = vmatpush3.bf16.xpose.msra.mxu0 %v5353_v1  ;;  %4844 = vmatprep.mubr.msk.bf16.mxu0 %vm5838_vm0, %v5837_v2  ;;  %v707_v6 = vld [vmem:[#allocation2] sm:$0xff]  ;;  %v5359_v10 = vld [vmem:[%s6316_s14 + $0x28] sm:$0xff]   ;;  %v5361_v12 = vld [vmem:[%s6316_s14 + $0x40] sm:$0xff]   ;;  %s7006_s4 = scalar_lea.vmem [#allocation3], %s6301_s0 }
 0x128   : > { %4849 = vmatpush3.bf16.xpose.msra.mxu1 %v5354_v3  ;;  %4842 = vmatprep.subr.bf16.mxu0 %v5837_v2  ;;  %v6376_v7 = vpack.c.bf16 %v707_v6, %v707_v6  ;;  %v5360_v11 = vld [vmem:[%s6316_s14 + $0x38] sm:$0xff]   ;;  %v5362_v13 = vld [vmem:[%s6316_s14 + $0x50] sm:$0xff]   ;;  %v5363_v14 = vld [vmem:[%s6316_s14 + $0x48] sm:$0xff]  }
 0x129   : > { %4850 = vmatprep.subr.bf16.mxu1 %v5837_v2  ;;  %4852 = vmatprep.mubr.msk.bf16.mxu1 %vm5838_vm0, %v5837_v2  ;;  %v5364_v15 = vld [vmem:[%s6316_s14 + $0x58] sm:$0xff]   ;;  %v5365_v16 = vld [vmem:[%s6316_s14 + $0x60] sm:$0xff]   ;;  %v5366_v17 = vld [vmem:[%s6316_s14 + $0x70] sm:$0xff]  }
 0x12a   : > { %v5367_v18 = vld [vmem:[%s6316_s14 + $0x68] sm:$0xff]   ;;  %v5368_v19 = vld [vmem:[%s6316_s14 + $0x78] sm:$0xff]   ;;  %v5369_v20 = vld [vmem:[%s6316_s14 + $0x80] sm:$0xff]  }
 0x12b   : > { %v5370_v21 = vld [vmem:[%s6316_s14 + $0x90] sm:$0xff]   ;;  %v5371_v22 = vld [vmem:[%s6316_s14 + $0x88] sm:$0xff]   ;;  %v5372_v23 = vld [vmem:[%s6316_s14 + $0x98] sm:$0xff]  }
 0x12c   : > { %v5373_v24 = vld [vmem:[%s6316_s14 + $0xa0] sm:$0xff]   ;;  %v5374_v25 = vld [vmem:[%s6316_s14 + $0xb0] sm:$0xff]   ;;  %v5375_v26 = vld [vmem:[%s6316_s14 + $0xa8] sm:$0xff]  }
 0x12d   : > { %v5376_v27 = vld [vmem:[%s6316_s14 + $0xb8] sm:$0xff]  }
 0x12e   : > { %v4466_v44 = vld [vmem:[%s6322_s27 + $0x4] ss:$0 sm:$0xff]  ;;  %v4467_v45 = vld [vmem:[%s6322_s27 + $0x5] ss:$0 sm:$0xff]  ;;  %v4454_v56 = vld [vmem:[%s6322_s27] ss:$0 sm:$0xff] }
 0x12f   : > { %4843 = vmatpush3.bf16.xpose.msra.mxu0 %v5355_v4  ;;  %v4455_v59 = vld [vmem:[%s6322_s27 + $0x1] ss:$0 sm:$0xff]  ;;  %v4468_v3 = vld [vmem:[%s6322_s27 + $0x6] ss:$0 sm:$0xff]  ;;  %v4469_v4 = vld [vmem:[%s6322_s27 + $0x7] ss:$0 sm:$0xff] }
 0x130   : > { %4851 = vmatpush3.bf16.xpose.msra.mxu1 %v5356_v5  ;;  %4856 = vmatprep.subr.bf16.mxu0 %v5837_v2 }
 0x131   : > { %4864 = vmatprep.subr.bf16.mxu1 %v5837_v2 }
 0x136   : > { %4845 = vmatmul.mubr.bf16.vlgmr.msra.gmra.mrb[0].mxu0 %v6376_v7 }
 0x137   : > { %4853 = vmatmul.mubr.bf16.vlgmr.msra.gmra.mrb[0].mxu1 %v6376_v7  ;;  %4857 = vmatpush3.bf16.xpose.msra.mxu0 %v5357_v8 }
 0x138   : > { %4865 = vmatpush3.bf16.xpose.msra.mxu1 %v5358_v9  ;;  %4858 = vmatprep.subr.bf16.mxu0 %v5837_v2 }
 0x139   : > { %4866 = vmatprep.subr.bf16.mxu1 %v5837_v2  ;;  %4860 = vmatprep.mubr.msk.bf16.mxu0 %vm5838_vm0, %v5837_v2 }
 0x13a   : > { %4868 = vmatprep.mubr.msk.bf16.mxu1 %vm5838_vm0, %v5837_v2 }
 0x13f   : > { %4859 = vmatpush3.bf16.xpose.msra.mxu0 %v5359_v10 }
 0x140   : > { %4867 = vmatpush3.bf16.xpose.msra.mxu1 %v5360_v11  ;;  %4872 = vmatprep.subr.bf16.mxu0 %v5837_v2 }
 0x141   : > { %4880 = vmatprep.subr.bf16.mxu1 %v5837_v2 }
 0x146   : > { %4861 = vmatmul.mubr.bf16.vlgmr.msra.gmra.mrb[4].mxu0 %v6376_v7 }
 0x147   : > { %4869 = vmatmul.mubr.bf16.vlgmr.msra.gmra.mrb[4].mxu1 %v6376_v7  ;;  %4873 = vmatpush3.bf16.xpose.msra.mxu0 %v5361_v12 }
 0x148   : > { %4881 = vmatpush3.bf16.xpose.msra.mxu1 %v5362_v13  ;;  %4874 = vmatprep.subr.bf16.mxu0 %v5837_v2 }
 0x149   : > { %4882 = vmatprep.subr.bf16.mxu1 %v5837_v2  ;;  %4876 = vmatprep.mubr.msk.bf16.mxu0 %vm5838_vm0, %v5837_v2 }
 0x14a   : > { %4884 = vmatprep.mubr.msk.bf16.mxu1 %vm5838_vm0, %v5837_v2 }
 0x14f   : > { %4875 = vmatpush3.bf16.xpose.msra.mxu0 %v5363_v14 }
 0x150   : > { %4883 = vmatpush3.bf16.xpose.msra.mxu1 %v5364_v15  ;;  %4888 = vmatprep.subr.bf16.mxu0 %v5837_v2  ;;  %v4456_v15 = vld [vmem:[%s6322_s27 + $0x2] ss:$0 sm:$0xff] }
 0x151   : > { %4896 = vmatprep.subr.bf16.mxu1 %v5837_v2 }
 0x156   : > { %4877 = vmatmul.mubr.bf16.vlgmr.msra.gmra.mrb[8].mxu0 %v6376_v7 }
 0x157   : > { %4885 = vmatmul.mubr.bf16.vlgmr.msra.gmra.mrb[8].mxu1 %v6376_v7  ;;  %4889 = vmatpush3.bf16.xpose.msra.mxu0 %v5365_v16 }
 0x158   : > { %4897 = vmatpush3.bf16.xpose.msra.mxu1 %v5366_v17  ;;  %4890 = vmatprep.subr.bf16.mxu0 %v5837_v2 }
 0x159   : > { %4898 = vmatprep.subr.bf16.mxu1 %v5837_v2  ;;  %4892 = vmatprep.mubr.msk.bf16.mxu0 %vm5838_vm0, %v5837_v2 }
 0x15a   : > { %4900 = vmatprep.mubr.msk.bf16.mxu1 %vm5838_vm0, %v5837_v2 }
 0x15f   : > { %4891 = vmatpush3.bf16.xpose.msra.mxu0 %v5367_v18  ;;  %v4457_v18 = vld [vmem:[%s6322_s27 + $0x3] ss:$0 sm:$0xff] }
 0x160   : > { %4899 = vmatpush3.bf16.xpose.msra.mxu1 %v5368_v19  ;;  %4904 = vmatprep.subr.bf16.mxu0 %v5837_v2 }
 0x161   : > { %4912 = vmatprep.subr.bf16.mxu1 %v5837_v2 }
 0x166   : > { %4893 = vmatmul.mubr.bf16.vlgmr.msra.gmra.mrb[12].mxu0 %v6376_v7 }
 0x167   : > { %4901 = vmatmul.mubr.bf16.vlgmr.msra.gmra.mrb[12].mxu1 %v6376_v7  ;;  %4908 = vmatprep.mubr.msk.bf16.mxu0 %vm5838_vm0, %v5837_v2 }
 0x168   : > { %4916 = vmatprep.mubr.msk.bf16.mxu1 %vm5838_vm0, %v5837_v2  ;;  %4905 = vmatpush3.bf16.xpose.msra.mxu0 %v5369_v20 }
 0x169   : > { %4913 = vmatpush3.bf16.xpose.msra.mxu1 %v5370_v21  ;;  %4906 = vmatprep.subr.bf16.mxu0 %v5837_v2 }
 0x16a   : > { %4914 = vmatprep.subr.bf16.mxu1 %v5837_v2 }
 0x170   : > { %4907 = vmatpush3.bf16.xpose.msra.mxu0 %v5371_v22 }
 0x171   : > { %4915 = vmatpush3.bf16.xpose.msra.mxu1 %v5372_v23  ;;  %4920 = vmatprep.subr.bf16.mxu0 %v5837_v2 }
 0x172   : > { %4928 = vmatprep.subr.bf16.mxu1 %v5837_v2 }
 0x177   : > { %4909 = vmatmul.mubr.bf16.vlgmr.msra.gmra.mrb[16].mxu0 %v6376_v7 }
 0x178   : > { %4917 = vmatmul.mubr.bf16.vlgmr.msra.gmra.mrb[16].mxu1 %v6376_v7  ;;  %4921 = vmatpush3.bf16.xpose.msra.mxu0 %v5373_v24 }
 0x179   : > { %4929 = vmatpush3.bf16.xpose.msra.mxu1 %v5374_v25  ;;  %4922 = vmatprep.subr.bf16.mxu0 %v5837_v2  ;;  %v4478_v25 = vld [vmem:[%s6322_s27 + $0x8] ss:$0 sm:$0xff] }
 0x17a   : > { %4930 = vmatprep.subr.bf16.mxu1 %v5837_v2  ;;  %4924 = vmatprep.mubr.msk.bf16.mxu0 %vm5838_vm0, %v5837_v2 }
 0x17b   : > { %4932 = vmatprep.mubr.msk.bf16.mxu1 %vm5838_vm0, %v5837_v2 }
 0x180   : > { %4923 = vmatpush3.bf16.xpose.msra.mxu0 %v5375_v26  ;;  %v4479_v26 = vld [vmem:[%s6322_s27 + $0x9] ss:$0 sm:$0xff] }
 0x181   : > { %4931 = vmatpush3.bf16.xpose.msra.mxu1 %v5376_v27  ;;  %4936 = vmatprep.subr.bf16.mxu0 %v5837_v2 }
 0x182   : > { %4942 = vmatprep.subr.bf16.mxu1 %v5837_v2 }
 0x187   : > { %4925 = vmatmul.mubr.bf16.vlgmr.msra.gmra.mrb[20].mxu0 %v6376_v7 }
 0x188   : > { %4933 = vmatmul.mubr.bf16.vlgmr.msra.gmra.mrb[20].mxu1 %v6376_v7  ;;  %4938 = vmatprep.mubr.msk.bf16.mxu0 %vm5838_vm0, %v5837_v2 }
 0x189   : > { %4944 = vmatprep.mubr.msk.bf16.mxu1 %vm5838_vm0, %v5837_v2 }
 0x209   : > { %v876_v28 = vpop.f32.mrb[0].mxu0 }
 0x20a   : > { %v4846_v29 = vpop.f32.mrb[1].mxu0  ;;  %v928_v30 = vpop.f32.mrb[0].mxu1  ;;  %v877_v62 = vadd.f32 %v4454_v56, %v876_v28 }
 0x20b   : > { %v879_v31 = vpop.f32.mrb[2].mxu0  ;;  %v4854_v32 = vpop.f32.mrb[1].mxu1  ;;  %v929_v63 = vadd.f32 %v4455_v59, %v928_v30 }
 0x20c   : > { %v4847_v33 = vpop.f32.mrb[3].mxu0  ;;  %v931_v34 = vpop.f32.mrb[2].mxu1  ;;  %v1502_v0 = vpack.c.bf16 %v877_v62, %v877_v62 }
 0x20d   : > { %v4855_v35 = vpop.f32.mrb[3].mxu1  ;;  %v1503_v1 = vpack.c.bf16 %v929_v63, %v929_v63 }
 0x219   : > { %v980_v36 = vpop.f32.mrb[4].mxu0 }
 0x21a   : > { %v4862_v37 = vpop.f32.mrb[5].mxu0  ;;  %v1032_v38 = vpop.f32.mrb[4].mxu1  ;;  %v981_v21 = vadd.f32 %v4456_v15, %v980_v36 }
 0x21b   : > { %v983_v39 = vpop.f32.mrb[6].mxu0  ;;  %v4870_v40 = vpop.f32.mrb[5].mxu1  ;;  %v1033_v22 = vadd.f32 %v4457_v18, %v1032_v38 }
 0x21c   : > { %v4863_v41 = vpop.f32.mrb[7].mxu0  ;;  %v1035_v42 = vpop.f32.mrb[6].mxu1  ;;  %v1504_v23 = vpack.c.bf16 %v981_v21, %v981_v21 }
 0x21d   : > { %v4871_v43 = vpop.f32.mrb[7].mxu1  ;;  %v1505_v24 = vpack.c.bf16 %v1033_v22, %v1033_v22 }
 0x229   : > { %v1108_v46 = vpop.f32.mrb[8].mxu0 }
 0x22a   : > { %v1109_v47 = vadd.f32 %v4466_v44, %v1108_v46  ;;  %v1160_v48 = vpop.f32.mrb[8].mxu1  ;;  %v4878_v49 = vpop.f32.mrb[9].mxu0 }
 0x22b   : > { %v1161_v50 = vadd.f32 %v4467_v45, %v1160_v48  ;;  %v1111_v51 = vpop.f32.mrb[10].mxu0  ;;  %v4886_v52 = vpop.f32.mrb[9].mxu1  ;;  %v710_v49 = vld [vmem:[%s7005_s1] sm:$0xff] }
 0x22c   : > { %v1506_v53 = vpack.c.bf16 %v1109_v47, %v1109_v47  ;;  %v4879_v54 = vpop.f32.mrb[11].mxu0  ;;  %v1163_v55 = vpop.f32.mrb[10].mxu1  ;;  %vm1699_vm3 = vcmp.eq.f32.partialorder %v710_v49, 0.0 }
 0x22d   : > { %v1507_v57 = vpack.c.bf16 %v1161_v50, %v1161_v50  ;;  %v4887_v58 = vpop.f32.mrb[11].mxu1 }
 0x22e   : > { %v1515_v60 = vsel %vm1510_vm1, %v1506_v53, 0 }
 0x22f   : > { %v1561_v61 = vsel %vm1510_vm1, %v1507_v57, 0  ;;  %4937 = vmatpush3.bf16.xpose.msra.mxu0 %v1515_v60 }
 0x230   : > { %4943 = vmatpush3.bf16.xpose.msra.mxu1 %v1561_v61  ;;  %4948 = vmatprep.subr.bf16.mxu0 %v5837_v2 }
 0x231   : > { %4954 = vmatprep.subr.bf16.mxu1 %v5837_v2 }
 0x236   : > { %4939 = vmatmul.mubr.msk.bf16.vlgmr.msra.gmra.mrb[24].mxu0 %vm1510_vm1, %v1502_v0 }
 0x237   : > { %4945 = vmatmul.mubr.msk.bf16.vlgmr.msra.gmra.mrb[24].mxu1 %vm1510_vm1, %v1503_v1  ;;  %4950 = vmatprep.mubr.msk.bf16.mxu0 %vm5838_vm0, %v5837_v2 }
 0x238   : > { %4956 = vmatprep.mubr.msk.bf16.mxu1 %vm5838_vm0, %v5837_v2 }
 0x239   : > { %v1212_v5 = vpop.f32.mrb[12].mxu0 }
 0x23a   : > { %v1213_v6 = vadd.f32 %v4468_v3, %v1212_v5  ;;  %v1264_v7 = vpop.f32.mrb[12].mxu1  ;;  %v4894_v8 = vpop.f32.mrb[13].mxu0 }
 0x23b   : > { %v1265_v9 = vadd.f32 %v4469_v4, %v1264_v7  ;;  %v1215_v10 = vpop.f32.mrb[14].mxu0  ;;  %v4902_v11 = vpop.f32.mrb[13].mxu1 }
 0x23c   : > { %v1508_v12 = vpack.c.bf16 %v1213_v6, %v1213_v6  ;;  %v4895_v13 = vpop.f32.mrb[15].mxu0  ;;  %v1267_v14 = vpop.f32.mrb[14].mxu1 }
 0x23d   : > { %v1509_v16 = vpack.c.bf16 %v1265_v9, %v1265_v9  ;;  %v4903_v17 = vpop.f32.mrb[15].mxu1 }
 0x23e   : > { %v1607_v19 = vsel %vm1510_vm1, %v1508_v12, 0 }
 0x23f   : > { %v1653_v20 = vsel %vm1510_vm1, %v1509_v16, 0  ;;  %4949 = vmatpush3.bf16.xpose.msra.mxu0 %v1607_v19 }
 0x240   : > { %4955 = vmatpush3.bf16.xpose.msra.mxu1 %v1653_v20  ;;  %4960 = vmatprep.subr.bf16.mxu0 %v5837_v2 }
 0x241   : > { %4966 = vmatprep.subr.bf16.mxu1 %v5837_v2 }
 0x246   : > { %4951 = vmatmul.mubr.msk.bf16.vlgmr.msra.gmra.mrb[28].mxu0 %vm1510_vm1, %v1504_v23 }
 0x247   : > { %4957 = vmatmul.mubr.msk.bf16.vlgmr.msra.gmra.mrb[28].mxu1 %vm1510_vm1, %v1505_v24  ;;  %4962 = vmatprep.mubr.msk.bf16.mxu0 %vm5838_vm0, %v5837_v2 }
 0x248   : > { %4968 = vmatprep.mubr.msk.bf16.mxu1 %vm5838_vm0, %v5837_v2 }
 0x24a   : > { %v1340_v27 = vpop.f32.mrb[16].mxu0 }
 0x24b   : > { %v1392_v28 = vpop.f32.mrb[16].mxu1  ;;  %v1341_v29 = vadd.f32 %v4478_v25, %v1340_v27  ;;  %v4910_v30 = vpop.f32.mrb[17].mxu0 }
 0x24c   : > { %v1393_v31 = vadd.f32 %v4479_v26, %v1392_v28  ;;  %v4918_v32 = vpop.f32.mrb[17].mxu1  ;;  %v1343_v33 = vpop.f32.mrb[18].mxu0 }
 0x24d   : > { %v1395_v34 = vpop.f32.mrb[18].mxu1  ;;  %v1755_v35 = vpack.c.bf16 %v1341_v29, %v1341_v29  ;;  %v4911_v36 = vpop.f32.mrb[19].mxu0 }
 0x24e   : > { %v1756_v37 = vpack.c.bf16 %v1393_v31, %v1393_v31  ;;  %v4919_v38 = vpop.f32.mrb[19].mxu1 }
 0x24f   : > { %v1764_v39 = vsel %vm1762_vm2, %v1755_v35, 0 }
 0x250   : > { %v1810_v40 = vsel %vm1762_vm2, %v1756_v37, 0  ;;  %4961 = vmatpush3.bf16.msra.mxu0 %v1764_v39  ;;  %v4480_v37 = vld [vmem:[%s6322_s27 + $0xa] ss:$0 sm:$0xff]  ;;  %v4481_v39 = vld [vmem:[%s6322_s27 + $0xb] ss:$0 sm:$0xff] }
 0x251   : > { %4967 = vmatpush3.bf16.msra.mxu1 %v1810_v40  ;;  %4972 = vmatprep.subr.bf16.mxu0 %v5837_v2 }
 0x252   : > { %4978 = vmatprep.subr.bf16.mxu1 %v5837_v2 }
 0x25a   : > { %v6488_v41 = vpop.f32.mrb[20].mxu0 }
 0x25b   : > { %v6490_v42 = vpop.f32.mrb[20].mxu1  ;;  %v4926_v43 = vpop.f32.mrb[21].mxu0  ;;  %v1445_v38 = vadd.f32 %v4480_v37, %v6488_v41  ;;  %v6558_v37 = vld [vmem:[%s6358_s30] sm:$0xff] }
 0x25c   : > { %v4934_v44 = vpop.f32.mrb[21].mxu1  ;;  %v1447_v45 = vpop.f32.mrb[22].mxu0 }
 0x25d   : > { %v1499_v46 = vpop.f32.mrb[22].mxu1  ;;  %v4927_v47 = vpop.f32.mrb[23].mxu0  ;;  %v1757_v43 = vpack.c.bf16 %v1445_v38, %v1445_v38  ;;  %v1497_v44 = vadd.f32 %v4481_v39, %v6490_v42 }
 0x25e   : > { %v4935_v48 = vpop.f32.mrb[23].mxu1 }
 0x25f   : > { %v1856_v48 = vsel %vm1762_vm2, %v1757_v43, 0  ;;  %v1758_v49 = vpack.c.bf16 %v1497_v44, %v1497_v44 }
 0x261   : > { %v1902_v42 = vsel %vm1762_vm2, %v1758_v49, 0 }
 0x309   : > { %v1551_v50 = vpop.f32.mrb[24].mxu0 }
 0x30a   : > { %v1695_v51 = vmul.f32 0.17677669, %v1551_v50  ;;  %v1597_v52 = vpop.f32.mrb[24].mxu1  ;;  %v4940_v53 = vpop.f32.mrb[25].mxu0 }
 0x30b   : > { %v1696_v54 = vmul.f32 0.17677669, %v1597_v52  ;;  %v4946_v55 = vpop.f32.mrb[25].mxu1  ;;  %v1554_v56 = vpop.f32.mrb[26].mxu0 }
 0x30c   : > { %v1600_v57 = vpop.f32.mrb[26].mxu1  ;;  %v4941_v58 = vpop.f32.mrb[27].mxu0  ;;  %v1702_v59 = vsel %vm1699_vm3, -10000.0, %v1695_v51  ;;  %v5377_v55 = vld [vmem:[%s6316_s14 + $0xc0] sm:$0xff]  }
 0x30d   : > { %v4947_v60 = vpop.f32.mrb[27].mxu1  ;;  %v1707_v61 = vsel %vm1706_vm4, %v1702_v59, -inf  ;;  %v1703_v62 = vsel %vm1699_vm3, -10000.0, %v1696_v54 }
 0x30e   : > { %1708 = vmax.xlane.f32.xlu0 %v1707_v61  ;;  %v1710_v63 = vsel %vm1706_vm4, %v1703_v62, -inf  ;;  %v5378_v60 = vld [vmem:[%s6316_s14 + $0xc8] sm:$0xff]   ;;  %v5379_v61 = vld [vmem:[%s6316_s14 + $0xd0] sm:$0xff]  }
 0x312   : > { %1711 = vmax.xlane.f32.xlu0 %v1710_v63 }
 0x319   : > { %v1643_v0 = vpop.f32.mrb[28].mxu0 }
 0x31a   : > { %v1697_v1 = vmul.f32 0.17677669, %v1643_v0  ;;  %v1689_v3 = vpop.f32.mrb[28].mxu1  ;;  %v4952_v4 = vpop.f32.mrb[29].mxu0  ;;  %v5381_v0 = vld [vmem:[%s6316_s14 + $0xe0] sm:$0xff]  }
 0x31b   : > { %v1698_v5 = vmul.f32 0.17677669, %v1689_v3  ;;  %v4958_v6 = vpop.f32.mrb[29].mxu1  ;;  %v1646_v7 = vpop.f32.mrb[30].mxu0 }
 0x31c   : > { %v1692_v8 = vpop.f32.mrb[30].mxu1  ;;  %v4953_v9 = vpop.f32.mrb[31].mxu0  ;;  %v1704_v10 = vsel %vm1699_vm3, -10000.0, %v1697_v1  ;;  %v5382_v7 = vld [vmem:[%s6316_s14 + $0xe8] sm:$0xff]  }
 0x31d   : > { %v4959_v11 = vpop.f32.mrb[31].mxu1  ;;  %v1713_v12 = vsel %vm1706_vm4, %v1704_v10, -inf  ;;  %v1705_v13 = vsel %vm1699_vm3, -10000.0, %v1698_v5  ;;  %v5383_v8 = vld [vmem:[%s6316_s14 + $0xf0] sm:$0xff]  }
 0x31e   : > { %1714 = vmax.xlane.f32.xlu1 %v1713_v12  ;;  %v1716_v14 = vsel %vm1706_vm4, %v1705_v13, -inf }
 0x322   : > { %1717 = vmax.xlane.f32.xlu1 %v1716_v14 }
 0x39b   : > { %v1709_v15 = vpop.xlane.xlu0 %1708 }
 0x39c   : > { %v1719_v16 = vsub.f32 %v1702_v59, %v1709_v15 }
 0x39e   : > { %v1723_v17 = vmul.f32 1.442695, %v1719_v16 }
 0x39f   : > { %v1712_v18 = vpop.xlane.xlu0 %1711 }
 0x3a0   : > { %5457 = vpow2.f32 %v1723_v17  ;;  %v1720_v19 = vsub.f32 %v1703_v62, %v1712_v18  ;;  %v5380_v62 = vld [vmem:[%s6316_s14 + $0xd8] sm:$0xff]  }
 0x3a2   : > { %v1725_v20 = vmul.f32 1.442695, %v1720_v19 }
 0x3a4   : > { %5459 = vpow2.f32 %v1725_v20 }
 0x3aa   : > { %v5458_v21 = vpop.eup %5457 }
 0x3ab   : > { %v1715_v22 = vpop.xlane.xlu1 %1714  ;;  %v1731_v23 = vsel %vm1706_vm4, %v5458_v21, 0.0 }
 0x3ac   : > { %v1721_v24 = vsub.f32 %v1704_v10, %v1715_v22  ;;  %1732 = vadd.xlane.f32.xlu0 %v1731_v23 }
 0x3ae   : > { %v5460_v25 = vpop.eup %5459  ;;  %v1727_v26 = vmul.f32 1.442695, %v1721_v24 }
 0x3af   : > { %v1718_v27 = vpop.xlane.xlu1 %1717  ;;  %v1734_v28 = vsel %vm1706_vm4, %v5460_v25, 0.0 }
 0x3b0   : > { %5461 = vpow2.f32 %v1727_v26  ;;  %v1722_v29 = vsub.f32 %v1705_v13, %v1718_v27  ;;  %1735 = vadd.xlane.f32.xlu1 %v1734_v28  ;;  %v5384_v13 = vld [vmem:[%s6316_s14 + $0xf8] sm:$0xff]  }
 0x3b2   : > { %v1729_v30 = vmul.f32 1.442695, %v1722_v29 }
 0x3b4   : > { %5463 = vpow2.f32 %v1729_v30 }
 0x3ba   : > { %v5462_v31 = vpop.eup %5461 }
 0x3bb   : > { %v1737_v32 = vsel %vm1706_vm4, %v5462_v31, 0.0 }
 0x3bc   : > { %1738 = vadd.xlane.f32.xlu0 %v1737_v32 }
 0x3be   : > { %v5464_v33 = vpop.eup %5463 }
 0x3bf   : > { %v1740_v34 = vsel %vm1706_vm4, %v5464_v33, 0.0 }
 0x3c0   : > { %1741 = vadd.xlane.f32.xlu1 %v1740_v34 }
 0x439   : > { %v1733_v35 = vpop.xlane.xlu0 %1732 }
 0x43a   : > { %5465 = vrcp.f32 %v1733_v35 }
 0x43d   : > { %v1736_v36 = vpop.xlane.xlu1 %1735 }
 0x43e   : > { %5467 = vrcp.f32 %v1736_v36 }
 0x444   : > { %v5466_v40 = vpop.eup %5465 }
 0x445   : > { %v1744_v45 = vmul.f32 %v5466_v40, %v5458_v21 }
 0x447   : > { %v1751_v46 = vpack.c.bf16 %v1744_v45, %v1744_v45 }
 0x448   : > { %v5468_v47 = vpop.eup %5467 }
 0x449   : > { %v1746_v50 = vmul.f32 %v5468_v47, %v5460_v25  ;;  %4963 = vmatmul.mubr.msk.bf16.vlgmr.msra.gmra.mrb[32].mxu0 %vm1706_vm4, %v1751_v46  ;;  %v1739_v51 = vpop.xlane.xlu0 %1738 }
 0x44a   : > { %4973 = vmatpush3.bf16.msra.mxu0 %v1856_v48  ;;  %5469 = vrcp.f32 %v1739_v51  ;;  %4974 = vmatprep.mubr.msk.bf16.mxu0 %vm5838_vm0, %v5837_v2  ;;  %v5495_v51 = vld [vmem:[#allocation2] sm:$0xff] }
 0x44b   : > { %v1752_v41 = vpack.c.bf16 %v1746_v50, %v1746_v50  ;;  %4984 = vmatprep.subr.bf16.mxu0 %v5837_v2 }
 0x44d   : > { %4969 = vmatmul.mubr.msk.bf16.vlgmr.msra.gmra.mrb[32].mxu1 %vm1706_vm4, %v1752_v41  ;;  %v1742_v52 = vpop.xlane.xlu1 %1741 }
 0x44e   : > { %4979 = vmatpush3.bf16.msra.mxu1 %v1902_v42  ;;  %5471 = vrcp.f32 %v1742_v52  ;;  %4980 = vmatprep.mubr.msk.bf16.mxu1 %vm5838_vm0, %v5837_v2 }
 0x44f   : > { %4992 = vmatprep.subr.bf16.mxu1 %v5837_v2 }
 0x454   : > { %v5470_v53 = vpop.eup %5469 }
 0x455   : > { %v1748_v54 = vmul.f32 %v5470_v53, %v5462_v31 }
 0x457   : > { %v1753_v56 = vpack.c.bf16 %v1748_v54, %v1748_v54 }
 0x458   : > { %v5472_v57 = vpop.eup %5471 }
 0x459   : > { %v1750_v58 = vmul.f32 %v5472_v57, %v5464_v33  ;;  %4975 = vmatmul.mubr.msk.bf16.vlgmr.msra.gmra.mrb[36].mxu0 %vm1706_vm4, %v1753_v56  ;;  %v2171_v33 = vlaneseq  ;;  %v5386_v56 = vld [vmem:[%s6316_s14 + $0x110] sm:$0xff]   ;;  %v5387_v57 = vld [vmem:[%s6316_s14 + $0x108] sm:$0xff]  }
 0x45a   : > { %4985 = vmatpush3.bf16.msra.mxu0 %v5377_v55  ;;  %4988 = vmatprep.mubr.msk.bf16.mxu0 %vm5838_vm0, %v5837_v2  ;;  %v5385_v55 = vld [vmem:[%s6316_s14 + $0x100] sm:$0xff]  }
 0x45b   : > { %v1754_v59 = vpack.c.bf16 %v1750_v58, %v1750_v58  ;;  %4986 = vmatprep.subr.bf16.mxu0 %v5837_v2  ;;  %v6554_v34 = vshrl.u32 %v2171_v33, 7  ;;  %v5388_v58 = vld [vmem:[%s6316_s14 + $0x118] sm:$0xff]  }
 0x45d   : > { %4981 = vmatmul.mubr.msk.bf16.vlgmr.msra.gmra.mrb[36].mxu1 %vm1706_vm4, %v1754_v59  ;;  %v2173_v35 = vsub.s32 6, %v6554_v34 }
 0x45e   : > { %4996 = vmatprep.mubr.msk.bf16.mxu1 %vm5838_vm0, %v5837_v2  ;;  %4987 = vmatpush3.bf16.msra.mxu0 %v5378_v60 }
 0x45f   : > { %4993 = vmatpush3.bf16.msra.mxu1 %v5379_v61  ;;  %5000 = vmatprep.subr.bf16.mxu0 %v5837_v2  ;;  %v2174_v44 = vrot.slane %v6558_v37, %v2173_v35 }
 0x460   : > { %4994 = vmatprep.subr.bf16.mxu1 %v5837_v2 }
 0x463   : > { %4995 = vmatpush3.bf16.msra.mxu1 %v5380_v62  ;;  %v6570_v62 = vsub.s32 0, %v6554_v34 }
 0x464   : > { %5008 = vmatprep.subr.bf16.mxu1 %v5837_v2 }
 0x51c   : > { %v1800_v63 = vpop.f32.mrb[32].mxu0 }
 0x51d   : > { %v1944_v1 = vpack.c.bf16 %v1800_v63, %v1800_v63  ;;  %v4964_v3 = vpop.f32.mrb[33].mxu0  ;;  %v2196_v63 = vsub.s32 1, %v6554_v34 }
 0x51e   : > { %v1803_v4 = vpop.f32.mrb[34].mxu0 }
 0x51f   : > { %v4965_v5 = vpop.f32.mrb[35].mxu0  ;;  %4989 = vmatmul.mubr.msk.bf16.vlgmr.msra.gmra.mrb[40].mxu0 %vm1510_vm1, %v1944_v1  ;;  %v2197_v4 = vrot.slane %v6558_v37, %v2196_v63 }
 0x520   : > { %v1846_v6 = vpop.f32.mrb[32].mxu1  ;;  %5001 = vmatpush3.bf16.msra.mxu0 %v5381_v0  ;;  %5004 = vmatprep.mubr.msk.bf16.mxu0 %vm5838_vm0, %v5837_v2  ;;  %v2192_v0 = vrot.slane %v6558_v37, %v6570_v62 }
 0x521   : > { %v1945_v9 = vpack.c.bf16 %v1846_v6, %v1846_v6  ;;  %v4970_v10 = vpop.f32.mrb[33].mxu1  ;;  %5002 = vmatprep.subr.bf16.mxu0 %v5837_v2 }
 0x522   : > { %v1849_v11 = vpop.f32.mrb[34].mxu1  ;;  %v5391_v10 = vld [vmem:[%s6316_s14 + $0x128] sm:$0xff]  }
 0x523   : > { %v4971_v12 = vpop.f32.mrb[35].mxu1  ;;  %4997 = vmatmul.mubr.msk.bf16.vlgmr.msra.gmra.mrb[40].mxu1 %vm1510_vm1, %v1945_v9  ;;  %v5392_v11 = vld [vmem:[%s6316_s14 + $0x138] sm:$0xff]  }
 0x524   : > { %5003 = vmatpush3.bf16.msra.mxu0 %v5382_v7  ;;  %5009 = vmatpush3.bf16.msra.mxu1 %v5383_v8  ;;  %v5389_v7 = vld [vmem:[%s6316_s14 + $0x120] sm:$0xff]   ;;  %v5390_v8 = vld [vmem:[%s6316_s14 + $0x130] sm:$0xff]  }
 0x525   : > { %5010 = vmatprep.subr.bf16.mxu1 %v5837_v2  ;;  %5012 = vmatprep.mubr.msk.bf16.mxu1 %vm5838_vm0, %v5837_v2  ;;  %v5393_v12 = vld [vmem:[%s6316_s14 + $0x140] sm:$0xff]  }
 0x526   : > { %5016 = vmatprep.subr.bf16.mxu0 %v5837_v2 }
 0x528   : > { %5011 = vmatpush3.bf16.msra.mxu1 %v5384_v13  ;;  %v5394_v13 = vld [vmem:[%s6316_s14 + $0x150] sm:$0xff]  }
 0x529   : > { %5024 = vmatprep.subr.bf16.mxu1 %v5837_v2 }
 0x52c   : > { %v1892_v14 = vpop.f32.mrb[36].mxu0 }
 0x52d   : > { %v1946_v15 = vpack.c.bf16 %v1892_v14, %v1892_v14  ;;  %v4976_v16 = vpop.f32.mrb[37].mxu0  ;;  %v5395_v14 = vld [vmem:[%s6316_s14 + $0x148] sm:$0xff]  }
 0x52e   : > { %v1895_v17 = vpop.f32.mrb[38].mxu0  ;;  %v708_v16 = vld [vmem:[%s7006_s4] sm:$0xff] }
 0x52f   : > { %v4977_v18 = vpop.f32.mrb[39].mxu0  ;;  %5005 = vmatmul.mubr.msk.bf16.vlgmr.msra.gmra.mrb[44].mxu0 %vm1510_vm1, %v1946_v15  ;;  %v5396_v15 = vld [vmem:[%s6316_s14 + $0x158] sm:$0xff]   ;;  %v709_v17 = vpack.c.bf16 %v708_v16, %v708_v16 }
 0x530   : > { %v1938_v19 = vpop.f32.mrb[36].mxu1  ;;  %5020 = vmatprep.mubr.msk.bf16.mxu0 %vm5838_vm0, %v5837_v2  ;;  %5017 = vmatpush3.bf16.xpose.msra.mxu0 %v5385_v55  ;;  %v5397_v18 = vld [vmem:[%s6316_s14 + $0x160] sm:$0xff]  }
 0x531   : > { %v1947_v20 = vpack.c.bf16 %v1938_v19, %v1938_v19  ;;  %v4982_v21 = vpop.f32.mrb[37].mxu1  ;;  %5018 = vmatprep.subr.bf16.mxu0 %v5837_v2  ;;  %v5398_v19 = vld [vmem:[%s6316_s14 + $0x170] sm:$0xff]  }
 0x532   : > { %v1941_v22 = vpop.f32.mrb[38].mxu1  ;;  %v5400_v21 = vld [vmem:[%s6316_s14 + $0x178] sm:$0xff]  }
 0x533   : > { %v4983_v23 = vpop.f32.mrb[39].mxu1  ;;  %5013 = vmatmul.mubr.msk.bf16.vlgmr.msra.gmra.mrb[44].mxu1 %vm1510_vm1, %v1947_v20  ;;  %v5399_v20 = vld [vmem:[%s6316_s14 + $0x168] sm:$0xff]   ;;  %v5401_v22 = vld [vmem:[%s6316_s14 + $0x180] sm:$0xff]  }
 0x534   : > { %5028 = vmatprep.mubr.msk.bf16.mxu1 %vm5838_vm0, %v5837_v2  ;;  %5025 = vmatpush3.bf16.xpose.msra.mxu1 %v5386_v56  ;;  %v5402_v23 = vld [vmem:[%s6316_s14 + $0x190] sm:$0xff]  }
 0x535   : > { %5026 = vmatprep.subr.bf16.mxu1 %v5837_v2 }
 0x538   : > { %5019 = vmatpush3.bf16.xpose.msra.mxu0 %v5387_v57 }
 0x539   : > { %5032 = vmatprep.subr.bf16.mxu0 %v5837_v2 }
 0x53c   : > { %5027 = vmatpush3.bf16.xpose.msra.mxu1 %v5388_v58 }
 0x53d   : > { %5040 = vmatprep.subr.bf16.mxu1 %v5837_v2 }
 0x5f2   : > { %v1997_v24 = vpop.f32.mrb[40].mxu0 }
 0x5f3   : > { %v4990_v25 = vpop.f32.mrb[41].mxu0 }
 0x5f4   : > { %v2000_v26 = vpop.f32.mrb[42].mxu0  ;;  %v5404_v25 = vld [vmem:[%s6316_s14 + $0x198] sm:$0xff]  }
 0x5f5   : > { %v4991_v27 = vpop.f32.mrb[43].mxu0  ;;  %v5405_v26 = vld [vmem:[%s6316_s14 + $0x1a0] sm:$0xff]  }
 0x5f6   : > { %v2052_v28 = vpop.f32.mrb[40].mxu1  ;;  %v5406_v27 = vld [vmem:[%s6316_s14 + $0x1b0] sm:$0xff]  }
 0x5f7   : > { %v2168_v29 = vadd.f32 %v2052_v28, %v1997_v24  ;;  %v4998_v30 = vpop.f32.mrb[41].mxu1  ;;  %v5403_v24 = vld [vmem:[%s6316_s14 + $0x188] sm:$0xff]  }
 0x5f8   : > { %v2055_v31 = vpop.f32.mrb[42].mxu1  ;;  %v5407_v28 = vld [vmem:[%s6316_s14 + $0x1a8] sm:$0xff]  }
 0x5f9   : > { %v4999_v32 = vpop.f32.mrb[43].mxu1 }
 0x602   : > { %v2107_v36 = vpop.f32.mrb[44].mxu0 }
 0x603   : > { %v2169_v38 = vadd.f32 %v2168_v29, %v2107_v36  ;;  %v5006_v39 = vpop.f32.mrb[45].mxu0  ;;  %v5408_v29 = vld [vmem:[%s6316_s14 + $0x1b8] sm:$0xff]  }
 0x604   : > { %v2110_v40 = vpop.f32.mrb[46].mxu0 }
 0x605   : > { %v5007_v43 = vpop.f32.mrb[47].mxu0 }
 0x606   : > { %v2162_v45 = vpop.f32.mrb[44].mxu1 }
 0x607   : > { %v2170_v46 = vadd.f32 %v2169_v38, %v2162_v45  ;;  %v5014_v47 = vpop.f32.mrb[45].mxu1 }
 0x608   : > { %v2165_v48 = vpop.f32.mrb[46].mxu1 }
 0x609   : > { %v2175_v49 = vadd.f32 %v2174_v44, %v2170_v46  ;;  %v5015_v50 = vpop.f32.mrb[47].mxu1 }
 0x60a   : > { %v4586_v50 = vld [vmem:[%s6322_s27 + $0x10] ss:$0 sm:$0xff] }
 0x60b   : > { %v2176_v41 = vadd.f32 %v5495_v51, %v2175_v49  ;;  %v4587_v51 = vld [vmem:[%s6322_s27 + $0x11] ss:$0 sm:$0xff] }
 0x60d   : > { %2177 = vadd.xlane.f32.xlu0 %v2176_v41 }
 0x69a   : > { %v2178_v42 = vpop.xlane.xlu0 %2177 }
 0x69b   : > { %v2180_v52 = vmul.f32 0.0078125, %v2178_v42 }
 0x69d   : > { %v2181_v53 = vsub.f32 %v2176_v41, %v2180_v52 }
 0x69f   : > { %v2182_v54 = vmul.f32 %v2181_v53, %v2181_v53 }
 0x6a1   : > { %2183 = vadd.xlane.f32.xlu1 %v2182_v54 }
 0x72e   : > { %v2184_v59 = vpop.xlane.xlu1 %2183 }
 0x72f   : > { %v2185_v60 = vmul.f32 0.0078125, %v2184_v59 }
 0x731   : > { %v2186_v61 = vadd.f32 1e-12, %v2185_v60 }
 0x733   : > { %5473 = vrsqrt.f32 %v2186_v61 }
 0x73d   : > { %v5474_v1 = vpop.eup %5473 }
 0x73e   : > { %v2188_v3 = vmul.f32 %v5474_v1, %v2181_v53  ;;  %v4575_v1 = vld [vmem:[%s6322_s27 + $0xd] ss:$0 sm:$0xff] }
 0x740   : > { %v2193_v5 = vmul.f32 %v2192_v0, %v2188_v3  ;;  %v4574_v0 = vld [vmem:[%s6322_s27 + $0xc] ss:$0 sm:$0xff] }
 0x742   : > { %v6578_v6 = vadd.f32 %v2197_v4, %v2193_v5 }
 0x744   : > { %v2199_v9 = vpack.c.bf16 %v6578_v6, %v6578_v6 }
 0x746   : > { %5021 = vmatmul.mubr.bf16.vlgmr.msra.gmra.mrb[48].mxu0 %v2199_v9  ;;  %5029 = vmatmul.mubr.bf16.vlgmr.msra.gmra.mrb[48].mxu1 %v2199_v9 }
 0x747   : > { %5033 = vmatpush3.bf16.xpose.msra.mxu0 %v5389_v7  ;;  %5041 = vmatpush3.bf16.xpose.msra.mxu1 %v5390_v8 }
 0x748   : > { %5034 = vmatprep.subr.bf16.mxu0 %v5837_v2  ;;  %5042 = vmatprep.subr.bf16.mxu1 %v5837_v2 }
 0x749   : > { %5036 = vmatprep.mubr.msk.bf16.mxu0 %vm5838_vm0, %v5837_v2  ;;  %5044 = vmatprep.mubr.msk.bf16.mxu1 %vm5838_vm0, %v5837_v2 }
 0x74f   : > { %5035 = vmatpush3.bf16.xpose.msra.mxu0 %v5391_v10  ;;  %5043 = vmatpush3.bf16.xpose.msra.mxu1 %v5392_v11  ;;  %v4588_v10 = vld [vmem:[%s6322_s27 + $0x12] ss:$0 sm:$0xff]  ;;  %v4589_v11 = vld [vmem:[%s6322_s27 + $0x13] ss:$0 sm:$0xff] }
 0x750   : > { %5048 = vmatprep.subr.bf16.mxu0 %v5837_v2  ;;  %5056 = vmatprep.subr.bf16.mxu1 %v5837_v2 }
 0x756   : > { %5037 = vmatmul.mubr.bf16.vlgmr.msra.gmra.mrb[52].mxu0 %v2199_v9  ;;  %5045 = vmatmul.mubr.bf16.vlgmr.msra.gmra.mrb[52].mxu1 %v2199_v9 }
 0x757   : > { %5049 = vmatpush3.bf16.xpose.msra.mxu0 %v5393_v12  ;;  %5057 = vmatpush3.bf16.xpose.msra.mxu1 %v5394_v13 }
 0x758   : > { %5050 = vmatprep.subr.bf16.mxu0 %v5837_v2  ;;  %5058 = vmatprep.subr.bf16.mxu1 %v5837_v2 }
 0x759   : > { %5052 = vmatprep.mubr.msk.bf16.mxu0 %vm5838_vm0, %v5837_v2  ;;  %5060 = vmatprep.mubr.msk.bf16.mxu1 %vm5838_vm0, %v5837_v2 }
 0x75f   : > { %5051 = vmatpush3.bf16.xpose.msra.mxu0 %v5395_v14  ;;  %5059 = vmatpush3.bf16.xpose.msra.mxu1 %v5396_v15 }
 0x760   : > { %5064 = vmatprep.subr.bf16.mxu0 %v5837_v2  ;;  %5072 = vmatprep.subr.bf16.mxu1 %v5837_v2 }
 0x766   : > { %5053 = vmatmul.mubr.bf16.vlgmr.msra.gmra.mrb[56].mxu0 %v709_v17  ;;  %5061 = vmatmul.mubr.bf16.vlgmr.msra.gmra.mrb[56].mxu1 %v709_v17 }
 0x767   : > { %5065 = vmatpush3.bf16.xpose.msra.mxu0 %v5397_v18  ;;  %5073 = vmatpush3.bf16.xpose.msra.mxu1 %v5398_v19 }
 0x768   : > { %5066 = vmatprep.subr.bf16.mxu0 %v5837_v2  ;;  %5074 = vmatprep.subr.bf16.mxu1 %v5837_v2 }
 0x769   : > { %5068 = vmatprep.mubr.msk.bf16.mxu0 %vm5838_vm0, %v5837_v2  ;;  %5076 = vmatprep.mubr.msk.bf16.mxu1 %vm5838_vm0, %v5837_v2 }
 0x76f   : > { %5067 = vmatpush3.bf16.xpose.msra.mxu0 %v5399_v20  ;;  %5075 = vmatpush3.bf16.xpose.msra.mxu1 %v5400_v21 }
 0x770   : > { %5080 = vmatprep.subr.bf16.mxu0 %v5837_v2  ;;  %5088 = vmatprep.subr.bf16.mxu1 %v5837_v2 }
 0x776   : > { %5069 = vmatmul.mubr.bf16.vlgmr.msra.gmra.mrb[60].mxu0 %v709_v17  ;;  %5077 = vmatmul.mubr.bf16.vlgmr.msra.gmra.mrb[60].mxu1 %v709_v17 }
 0x777   : > { %5084 = vmatprep.mubr.msk.bf16.mxu0 %vm5838_vm0, %v5837_v2  ;;  %5092 = vmatprep.mubr.msk.bf16.mxu1 %vm5838_vm0, %v5837_v2 }
 0x778   : > { %5081 = vmatpush3.bf16.xpose.msra.mxu0 %v5401_v22  ;;  %5089 = vmatpush3.bf16.xpose.msra.mxu1 %v5402_v23 }
 0x779   : > { %5082 = vmatprep.subr.bf16.mxu0 %v5837_v2  ;;  %5090 = vmatprep.subr.bf16.mxu1 %v5837_v2 }
 0x780   : > { %5083 = vmatpush3.bf16.xpose.msra.mxu0 %v5403_v24  ;;  %5091 = vmatpush3.bf16.xpose.msra.mxu1 %v5404_v25  ;;  %v4576_v24 = vld [vmem:[%s6322_s27 + $0xe] ss:$0 sm:$0xff]  ;;  %v4577_v25 = vld [vmem:[%s6322_s27 + $0xf] ss:$0 sm:$0xff] }
 0x781   : > { %5096 = vmatprep.subr.bf16.mxu0 %v5837_v2  ;;  %5104 = vmatprep.subr.bf16.mxu1 %v5837_v2 }
 0x787   : > { %5085 = vmatmul.mubr.bf16.vlgmr.msra.gmra.mrb[64].mxu0 %v709_v17  ;;  %5093 = vmatmul.mubr.bf16.vlgmr.msra.gmra.mrb[64].mxu1 %v709_v17 }
 0x788   : > { %5097 = vmatpush3.bf16.xpose.msra.mxu0 %v5405_v26  ;;  %5105 = vmatpush3.bf16.xpose.msra.mxu1 %v5406_v27 }
 0x789   : > { %5098 = vmatprep.subr.bf16.mxu0 %v5837_v2  ;;  %5106 = vmatprep.subr.bf16.mxu1 %v5837_v2 }
 0x78a   : > { %5100 = vmatprep.mubr.msk.bf16.mxu0 %vm5838_vm0, %v5837_v2  ;;  %5108 = vmatprep.mubr.msk.bf16.mxu1 %vm5838_vm0, %v5837_v2 }
 0x790   : > { %5099 = vmatpush3.bf16.xpose.msra.mxu0 %v5407_v28  ;;  %5107 = vmatpush3.bf16.xpose.msra.mxu1 %v5408_v29 }
 0x791   : > { %5112 = vmatprep.subr.bf16.mxu0 %v5837_v2  ;;  %5118 = vmatprep.subr.bf16.mxu1 %v5837_v2 }
 0x797   : > { %5101 = vmatmul.mubr.bf16.vlgmr.msra.gmra.mrb[68].mxu0 %v709_v17  ;;  %5109 = vmatmul.mubr.bf16.vlgmr.msra.gmra.mrb[68].mxu1 %v709_v17 }
 0x798   : > { %5114 = vmatprep.mubr.msk.bf16.mxu0 %vm5838_vm0, %v5837_v2  ;;  %5120 = vmatprep.mubr.msk.bf16.mxu1 %vm5838_vm0, %v5837_v2 }
 0x819   : > { %v2338_v30 = vpop.f32.mrb[48].mxu0  ;;  %v2390_v31 = vpop.f32.mrb[48].mxu1 }
 0x81a   : > { %v5022_v32 = vpop.f32.mrb[49].mxu0  ;;  %v5030_v33 = vpop.f32.mrb[49].mxu1  ;;  %v2339_v5 = vadd.f32 %v4574_v0, %v2338_v30  ;;  %v2391_v7 = vadd.f32 %v4575_v1, %v2390_v31 }
 0x81b   : > { %v2341_v35 = vpop.f32.mrb[50].mxu0  ;;  %v2393_v36 = vpop.f32.mrb[50].mxu1  ;;  %v4598_v32 = vld [vmem:[%s6322_s27 + $0x14] ss:$0 sm:$0xff]  ;;  %v4599_v33 = vld [vmem:[%s6322_s27 + $0x15] ss:$0 sm:$0xff] }
 0x81c   : > { %v5023_v38 = vpop.f32.mrb[51].mxu0  ;;  %v5031_v39 = vpop.f32.mrb[51].mxu1  ;;  %v2964_v8 = vpack.c.bf16 %v2339_v5, %v2339_v5  ;;  %v2965_v9 = vpack.c.bf16 %v2391_v7, %v2391_v7 }
 0x829   : > { %v2442_v40 = vpop.f32.mrb[52].mxu0  ;;  %v2494_v43 = vpop.f32.mrb[52].mxu1 }
 0x82a   : > { %v5038_v44 = vpop.f32.mrb[53].mxu0  ;;  %v5046_v45 = vpop.f32.mrb[53].mxu1  ;;  %v2443_v28 = vadd.f32 %v4576_v24, %v2442_v40  ;;  %v2495_v29 = vadd.f32 %v4577_v25, %v2494_v43 }
 0x82b   : > { %v2445_v46 = vpop.f32.mrb[54].mxu0  ;;  %v2497_v47 = vpop.f32.mrb[54].mxu1 }
 0x82c   : > { %v5039_v48 = vpop.f32.mrb[55].mxu0  ;;  %v5047_v49 = vpop.f32.mrb[55].mxu1  ;;  %v2966_v30 = vpack.c.bf16 %v2443_v28, %v2443_v28  ;;  %v2967_v31 = vpack.c.bf16 %v2495_v29, %v2495_v29 }
 0x839   : > { %v2570_v41 = vpop.f32.mrb[56].mxu0  ;;  %v2622_v42 = vpop.f32.mrb[56].mxu1 }
 0x83a   : > { %v2571_v52 = vadd.f32 %v4586_v50, %v2570_v41  ;;  %v2623_v53 = vadd.f32 %v4587_v51, %v2622_v42  ;;  %v5054_v54 = vpop.f32.mrb[57].mxu0  ;;  %v5062_v55 = vpop.f32.mrb[57].mxu1 }
 0x83b   : > { %v2573_v56 = vpop.f32.mrb[58].mxu0  ;;  %v2625_v57 = vpop.f32.mrb[58].mxu1 }
 0x83c   : > { %v2968_v58 = vpack.c.bf16 %v2571_v52, %v2571_v52  ;;  %v2969_v59 = vpack.c.bf16 %v2623_v53, %v2623_v53  ;;  %v5055_v60 = vpop.f32.mrb[59].mxu0  ;;  %v5063_v61 = vpop.f32.mrb[59].mxu1 }
 0x83e   : > { %v2976_v3 = vsel %vm1510_vm1, %v2968_v58, 0  ;;  %v3022_v4 = vsel %vm1510_vm1, %v2969_v59, 0  ;;  %v711_v58 = vld [vmem:[%s690_s15] sm:$0x1]  ;;  %v5839_v59 = vmov 0  }
 0x83f   : > { %5113 = vmatpush3.bf16.xpose.msra.mxu0 %v2976_v3  ;;  %5119 = vmatpush3.bf16.xpose.msra.mxu1 %v3022_v4  ;;  %vm3160_vm5 = vcmp.eq.f32.partialorder %v711_v58, 0.0  ;;  %v4600_v58 = vld [vmem:[%s6322_s27 + $0x16] ss:$0 sm:$0xff] }
 0x840   : > { %5124 = vmatprep.subr.bf16.mxu0 %v5837_v2  ;;  %5130 = vmatprep.subr.bf16.mxu1 %v5837_v2  ;;  %v3161_v60 = vsel %vm3160_vm5, 1, %v5839_v59 }
 0x841   : > { %v3165_v61 = vrot.slane %v3161_v60, %v6570_v62 }
 0x843   : > { %vm6693_vm6 = vcmp.eq.s32.totalorder %v3165_v61, 1 }
 0x846   : > { %5115 = vmatmul.mubr.msk.bf16.vlgmr.msra.gmra.mrb[72].mxu0 %vm1510_vm1, %v2964_v8  ;;  %5121 = vmatmul.mubr.msk.bf16.vlgmr.msra.gmra.mrb[72].mxu1 %vm1510_vm1, %v2965_v9 }
 0x847   : > { %5126 = vmatprep.mubr.msk.bf16.mxu0 %vm5838_vm0, %v5837_v2  ;;  %5132 = vmatprep.mubr.msk.bf16.mxu1 %vm5838_vm0, %v5837_v2 }
 0x849   : > { %v2674_v12 = vpop.f32.mrb[60].mxu0  ;;  %v2726_v13 = vpop.f32.mrb[60].mxu1 }
 0x84a   : > { %v2675_v14 = vadd.f32 %v4588_v10, %v2674_v12  ;;  %v2727_v15 = vadd.f32 %v4589_v11, %v2726_v13  ;;  %v5070_v16 = vpop.f32.mrb[61].mxu0  ;;  %v5078_v17 = vpop.f32.mrb[61].mxu1 }
 0x84b   : > { %v2677_v18 = vpop.f32.mrb[62].mxu0  ;;  %v2729_v19 = vpop.f32.mrb[62].mxu1 }
 0x84c   : > { %v2970_v20 = vpack.c.bf16 %v2675_v14, %v2675_v14  ;;  %v2971_v21 = vpack.c.bf16 %v2727_v15, %v2727_v15  ;;  %v5071_v22 = vpop.f32.mrb[63].mxu0  ;;  %v5079_v23 = vpop.f32.mrb[63].mxu1 }
 0x84e   : > { %v3068_v26 = vsel %vm1510_vm1, %v2970_v20, 0  ;;  %v3114_v27 = vsel %vm1510_vm1, %v2971_v21, 0 }
 0x84f   : > { %5125 = vmatpush3.bf16.xpose.msra.mxu0 %v3068_v26  ;;  %5131 = vmatpush3.bf16.xpose.msra.mxu1 %v3114_v27 }
 0x850   : > { %5136 = vmatprep.subr.bf16.mxu0 %v5837_v2  ;;  %5142 = vmatprep.subr.bf16.mxu1 %v5837_v2 }
 0x856   : > { %5127 = vmatmul.mubr.msk.bf16.vlgmr.msra.gmra.mrb[76].mxu0 %vm1510_vm1, %v2966_v30  ;;  %5133 = vmatmul.mubr.msk.bf16.vlgmr.msra.gmra.mrb[76].mxu1 %vm1510_vm1, %v2967_v31 }
 0x857   : > { %5138 = vmatprep.mubr.msk.bf16.mxu0 %vm5838_vm0, %v5837_v2  ;;  %5144 = vmatprep.mubr.msk.bf16.mxu1 %vm5838_vm0, %v5837_v2 }
 0x85a   : > { %v2802_v35 = vpop.f32.mrb[64].mxu0  ;;  %v2854_v36 = vpop.f32.mrb[64].mxu1 }
 0x85b   : > { %v2803_v38 = vadd.f32 %v4598_v32, %v2802_v35  ;;  %v5086_v39 = vpop.f32.mrb[65].mxu0  ;;  %v2855_v40 = vadd.f32 %v4599_v33, %v2854_v36  ;;  %v5094_v43 = vpop.f32.mrb[65].mxu1 }
 0x85c   : > { %v2805_v44 = vpop.f32.mrb[66].mxu0  ;;  %v2857_v45 = vpop.f32.mrb[66].mxu1 }
 0x85d   : > { %v3219_v46 = vpack.c.bf16 %v2803_v38, %v2803_v38  ;;  %v3220_v47 = vpack.c.bf16 %v2855_v40, %v2855_v40  ;;  %v5087_v48 = vpop.f32.mrb[67].mxu0  ;;  %v5095_v49 = vpop.f32.mrb[67].mxu1 }
 0x85f   : > { %v3227_v50 = vsel %vm1762_vm2, %v3219_v46, 0  ;;  %v3273_v51 = vsel %vm1762_vm2, %v3220_v47, 0 }
 0x860   : > { %5137 = vmatpush3.bf16.msra.mxu0 %v3227_v50  ;;  %5143 = vmatpush3.bf16.msra.mxu1 %v3273_v51 }
 0x861   : > { %5148 = vmatprep.subr.bf16.mxu0 %v5837_v2  ;;  %5154 = vmatprep.subr.bf16.mxu1 %v5837_v2 }
 0x86a   : > { %v6682_v41 = vpop.f32.mrb[68].mxu0  ;;  %v6684_v42 = vpop.f32.mrb[68].mxu1 }
 0x86b   : > { %v5102_v52 = vpop.f32.mrb[69].mxu0  ;;  %v5110_v53 = vpop.f32.mrb[69].mxu1  ;;  %v2907_v61 = vadd.f32 %v4600_v58, %v6682_v41  ;;  %v3636_v58 = vsub.s32 7, %v6554_v34 }
 0x86c   : > { %v2909_v54 = vpop.f32.mrb[70].mxu0  ;;  %v2961_v55 = vpop.f32.mrb[70].mxu1 }
 0x86d   : > { %v5103_v56 = vpop.f32.mrb[71].mxu0  ;;  %v5111_v57 = vpop.f32.mrb[71].mxu1 }
 0x86e   : > { %v4601_v57 = vld [vmem:[%s6322_s27 + $0x17] ss:$0 sm:$0xff] }
 0x86f   : > { %v2959_v60 = vadd.f32 %v4601_v57, %v6684_v42 }
 0x871   : > { %v3222_v3 = vpack.c.bf16 %v2959_v60, %v2959_v60 }
 0x919   : > { %v3012_v0 = vpop.f32.mrb[72].mxu0  ;;  %v3058_v1 = vpop.f32.mrb[72].mxu1 }
 0x91a   : > { %v3156_v4 = vmul.f32 0.17677669, %v3012_v0  ;;  %v3157_v5 = vmul.f32 0.17677669, %v3058_v1  ;;  %v5116_v7 = vpop.f32.mrb[73].mxu0  ;;  %v5122_v8 = vpop.f32.mrb[73].mxu1 }
 0x91b   : > { %v3015_v9 = vpop.f32.mrb[74].mxu0  ;;  %v3061_v10 = vpop.f32.mrb[74].mxu1 }
 0x91c   : > { %v5117_v11 = vpop.f32.mrb[75].mxu0  ;;  %v5123_v12 = vpop.f32.mrb[75].mxu1  ;;  %v3168_v13 = vsel %vm6693_vm6, -10000.0, %v3157_v5  ;;  %v3167_v14 = vsel %vm6693_vm6, -10000.0, %v3156_v4  ;;  %v3221_v5 = vpack.c.bf16 %v2907_v61, %v2907_v61  ;;  %v3365_v10 = vsel %vm1762_vm2, %v3222_v3, 0 }
 0x91d   : > { %v3174_v15 = vsel %vm1706_vm4, %v3168_v13, -inf  ;;  %v3171_v16 = vsel %vm1706_vm4, %v3167_v14, -inf }
 0x91e   : > { %3175 = vmax.xlane.f32.xlu1 %v3174_v15  ;;  %3172 = vmax.xlane.f32.xlu0 %v3171_v16  ;;  %v3319_v12 = vsel %vm1762_vm2, %v3221_v5, 0  ;;  %v5410_v16 = vld [vmem:[%s6316_s14 + $0x1d0] sm:$0xff]  }
 0x929   : > { %v3104_v17 = vpop.f32.mrb[76].mxu0  ;;  %v3150_v18 = vpop.f32.mrb[76].mxu1 }
 0x92a   : > { %v3158_v19 = vmul.f32 0.17677669, %v3104_v17  ;;  %v3159_v20 = vmul.f32 0.17677669, %v3150_v18  ;;  %v5128_v21 = vpop.f32.mrb[77].mxu0  ;;  %v5134_v22 = vpop.f32.mrb[77].mxu1 }
 0x92b   : > { %v3107_v23 = vpop.f32.mrb[78].mxu0  ;;  %v3153_v24 = vpop.f32.mrb[78].mxu1  ;;  %v5409_v18 = vld [vmem:[%s6316_s14 + $0x1c0] sm:$0xff]   ;;  %v5412_v21 = vld [vmem:[%s6316_s14 + $0x1d8] sm:$0xff]  }
 0x92c   : > { %v5129_v25 = vpop.f32.mrb[79].mxu0  ;;  %v5135_v26 = vpop.f32.mrb[79].mxu1  ;;  %v3170_v27 = vsel %vm6693_vm6, -10000.0, %v3159_v20  ;;  %v3169_v28 = vsel %vm6693_vm6, -10000.0, %v3158_v19  ;;  %v5411_v20 = vld [vmem:[%s6316_s14 + $0x1c8] sm:$0xff]   ;;  %v5414_v23 = vld [vmem:[%s6316_s14 + $0x1f0] sm:$0xff]  }
 0x92d   : > { %v3180_v29 = vsel %vm1706_vm4, %v3170_v27, -inf  ;;  %v3177_v30 = vsel %vm1706_vm4, %v3169_v28, -inf }
 0x92e   : > { %3181 = vmax.xlane.f32.xlu1 %v3180_v29  ;;  %3178 = vmax.xlane.f32.xlu0 %v3177_v30 }
 0x9ab   : > { %v3176_v31 = vpop.xlane.xlu1 %3175  ;;  %v3173_v32 = vpop.xlane.xlu0 %3172 }
 0x9ac   : > { %v3184_v33 = vsub.f32 %v3168_v13, %v3176_v31  ;;  %v3183_v35 = vsub.f32 %v3167_v14, %v3173_v32 }
 0x9ae   : > { %v3189_v36 = vmul.f32 1.442695, %v3184_v33  ;;  %v3187_v38 = vmul.f32 1.442695, %v3183_v35  ;;  %v5416_v35 = vld [vmem:[%s6316_s14 + $0x1f8] sm:$0xff]  }
 0x9b0   : > { %5475 = vpow2.f32 %v3189_v36  ;;  %v5415_v36 = vld [vmem:[%s6316_s14 + $0x1e8] sm:$0xff]  }
 0x9b1   : > { %5477 = vpow2.f32 %v3187_v38 }
 0x9ba   : > { %v5476_v39 = vpop.eup %5475 }
 0x9bb   : > { %v5478_v40 = vpop.eup %5477  ;;  %v3182_v43 = vpop.xlane.xlu1 %3181  ;;  %v3198_v45 = vsel %vm1706_vm4, %v5476_v39, 0.0 }
 0x9bc   : > { %v3179_v44 = vpop.xlane.xlu0 %3178  ;;  %v3186_v46 = vsub.f32 %v3170_v27, %v3182_v43  ;;  %3199 = vadd.xlane.f32.xlu1 %v3198_v45  ;;  %v3195_v48 = vsel %vm1706_vm4, %v5478_v40, 0.0  ;;  %v5413_v27 = vld [vmem:[%s6316_s14 + $0x1e0] sm:$0xff]  }
 0x9bd   : > { %v3185_v47 = vsub.f32 %v3169_v28, %v3179_v44  ;;  %3196 = vadd.xlane.f32.xlu0 %v3195_v48 }
 0x9be   : > { %v3193_v49 = vmul.f32 1.442695, %v3186_v46 }
 0x9bf   : > { %v3191_v50 = vmul.f32 1.442695, %v3185_v47 }
 0x9c0   : > { %5479 = vpow2.f32 %v3193_v49 }
 0x9c1   : > { %5481 = vpow2.f32 %v3191_v50 }
 0x9ca   : > { %v5480_v51 = vpop.eup %5479 }
 0x9cb   : > { %v5482_v52 = vpop.eup %5481  ;;  %v3204_v53 = vsel %vm1706_vm4, %v5480_v51, 0.0 }
 0x9cc   : > { %3205 = vadd.xlane.f32.xlu1 %v3204_v53  ;;  %v3201_v54 = vsel %vm1706_vm4, %v5482_v52, 0.0 }
 0x9cd   : > { %3202 = vadd.xlane.f32.xlu0 %v3201_v54 }
 0xa49   : > { %v3200_v55 = vpop.xlane.xlu1 %3199 }
 0xa4a   : > { %5483 = vrcp.f32 %v3200_v55  ;;  %v3197_v56 = vpop.xlane.xlu0 %3196 }
 0xa4b   : > { %5485 = vrcp.f32 %v3197_v56 }
 0xa54   : > { %v5484_v0 = vpop.eup %5483 }
 0xa55   : > { %v5486_v1 = vpop.eup %5485  ;;  %v3210_v4 = vmul.f32 %v5484_v0, %v5476_v39 }
 0xa56   : > { %v3208_v7 = vmul.f32 %v5486_v1, %v5478_v40 }
 0xa57   : > { %v3216_v8 = vpack.c.bf16 %v3210_v4, %v3210_v4 }
 0xa58   : > { %v3215_v9 = vpack.c.bf16 %v3208_v7, %v3208_v7 }
 0xa59   : > { %5145 = vmatmul.mubr.msk.bf16.vlgmr.msra.gmra.mrb[80].mxu1 %vm1706_vm4, %v3216_v8  ;;  %v3206_v11 = vpop.xlane.xlu1 %3205 }
 0xa5a   : > { %5155 = vmatpush3.bf16.msra.mxu1 %v3365_v10  ;;  %5487 = vrcp.f32 %v3206_v11  ;;  %5139 = vmatmul.mubr.msk.bf16.vlgmr.msra.gmra.mrb[80].mxu0 %vm1706_vm4, %v3215_v9  ;;  %v3203_v41 = vpop.xlane.xlu0 %3202 }
 0xa5b   : > { %5149 = vmatpush3.bf16.msra.mxu0 %v3319_v12  ;;  %5489 = vrcp.f32 %v3203_v41  ;;  %5150 = vmatprep.mubr.msk.bf16.mxu0 %vm5838_vm0, %v5837_v2  ;;  %v5417_v12 = vld [vmem:[%s6328_s17] ss:$8 sps:$4 sm:$0xff]   ;;  %v5419_v41 = vld [vmem:[%s6328_s17 + $0x4] ss:$8 sps:$4 sm:$0xff]  }
 0xa5c   : > { %5156 = vmatprep.mubr.msk.bf16.mxu1 %vm5838_vm0, %v5837_v2  ;;  %5160 = vmatprep.subr.bf16.mxu0 %v5837_v2 }
 0xa5d   : > { %5168 = vmatprep.subr.bf16.mxu1 %v5837_v2 }
 0xa64   : > { %v5488_v42 = vpop.eup %5487 }
 0xa65   : > { %v5490_v13 = vpop.eup %5489  ;;  %v3214_v14 = vmul.f32 %v5488_v42, %v5480_v51  ;;  %v5422_v42 = vld [vmem:[%s6328_s17 + $0x14] ss:$8 sps:$4 sm:$0xff]  }
 0xa66   : > { %v3212_v15 = vmul.f32 %v5490_v13, %v5482_v52  ;;  %v5420_v13 = vld [vmem:[%s6328_s17 + $0x10] ss:$8 sps:$4 sm:$0xff]  }
 0xa67   : > { %v3218_v17 = vpack.c.bf16 %v3214_v14, %v3214_v14  ;;  %v5425_v14 = vld [vmem:[%s6328_s17 + $0x24] ss:$8 sps:$4 sm:$0xff]  }
 0xa68   : > { %v3217_v19 = vpack.c.bf16 %v3212_v15, %v3212_v15  ;;  %v5423_v15 = vld [vmem:[%s6328_s17 + $0x20] ss:$8 sps:$4 sm:$0xff]  }
 0xa69   : > { %5157 = vmatmul.mubr.msk.bf16.vlgmr.msra.gmra.mrb[84].mxu1 %vm1706_vm4, %v3218_v17 }
 0xa6a   : > { %5151 = vmatmul.mubr.msk.bf16.vlgmr.msra.gmra.mrb[84].mxu0 %vm1706_vm4, %v3217_v19  ;;  %5169 = vmatpush3.bf16.msra.mxu1 %v5410_v16  ;;  %v5428_v19 = vld [vmem:[%s6328_s17 + $0x34] ss:$8 sps:$4 sm:$0xff]  }
 0xa6b   : > { %5161 = vmatpush3.bf16.msra.mxu0 %v5409_v18  ;;  %5170 = vmatprep.subr.bf16.mxu1 %v5837_v2 }
 0xa6c   : > { %5162 = vmatprep.subr.bf16.mxu0 %v5837_v2  ;;  %5164 = vmatprep.mubr.msk.bf16.mxu0 %vm5838_vm0, %v5837_v2 }
 0xa6d   : > { %5172 = vmatprep.mubr.msk.bf16.mxu1 %vm5838_vm0, %v5837_v2 }
 0xa6e   : > { %5171 = vmatpush3.bf16.msra.mxu1 %v5412_v21  ;;  %v5431_v21 = vld [vmem:[%s6328_s17 + $0x44] ss:$8 sps:$4 sm:$0xff]  }
 0xa6f   : > { %5163 = vmatpush3.bf16.msra.mxu0 %v5411_v20  ;;  %5184 = vmatprep.subr.bf16.mxu1 %v5837_v2  ;;  %v5426_v20 = vld [vmem:[%s6328_s17 + $0x30] ss:$8 sps:$4 sm:$0xff]  }
 0xa70   : > { %5176 = vmatprep.subr.bf16.mxu0 %v5837_v2 }
 0xb2c   : > { %v3309_v22 = vpop.f32.mrb[80].mxu1 }
 0xb2d   : > { %v3263_v24 = vpop.f32.mrb[80].mxu0  ;;  %v3408_v25 = vpack.c.bf16 %v3309_v22, %v3309_v22  ;;  %v5146_v26 = vpop.f32.mrb[81].mxu1  ;;  %v5429_v22 = vld [vmem:[%s6328_s17 + $0x40] ss:$8 sps:$4 sm:$0xff]  }
 0xb2e   : > { %v3407_v28 = vpack.c.bf16 %v3263_v24, %v3263_v24  ;;  %v5140_v29 = vpop.f32.mrb[81].mxu0  ;;  %v3312_v30 = vpop.f32.mrb[82].mxu1  ;;  %v5432_v24 = vld [vmem:[%s6328_s17 + $0x50] ss:$8 sps:$4 sm:$0xff]   ;;  %v5435_v26 = vld [vmem:[%s6328_s17 + $0x60] ss:$8 sps:$4 sm:$0xff]  }
 0xb2f   : > { %v3266_v31 = vpop.f32.mrb[82].mxu0  ;;  %v5147_v32 = vpop.f32.mrb[83].mxu1  ;;  %5173 = vmatmul.mubr.msk.bf16.vlgmr.msra.gmra.mrb[88].mxu1 %vm1510_vm1, %v3408_v25  ;;  %v5437_v25 = vld [vmem:[%s6328_s17 + $0x64] ss:$8 sps:$4 sm:$0xff]  }
 0xb30   : > { %v5141_v33 = vpop.f32.mrb[83].mxu0  ;;  %5165 = vmatmul.mubr.msk.bf16.vlgmr.msra.gmra.mrb[88].mxu0 %vm1510_vm1, %v3407_v28  ;;  %5185 = vmatpush3.bf16.msra.mxu1 %v5414_v23  ;;  %v5434_v23 = vld [vmem:[%s6328_s17 + $0x54] ss:$8 sps:$4 sm:$0xff]   ;;  %v5438_v28 = vld [vmem:[%s6328_s17 + $0x70] ss:$8 sps:$4 sm:$0xff]   ;;  %v5441_v29 = vld [vmem:[%s6330_s8 + $0x40] sm:$0xff]  }
 0xb31   : > { %5177 = vmatpush3.bf16.msra.mxu0 %v5413_v27  ;;  %5186 = vmatprep.subr.bf16.mxu1 %v5837_v2  ;;  %v5440_v27 = vld [vmem:[%s6328_s17 + $0x74] ss:$8 sps:$4 sm:$0xff]   ;;  %v5442_v30 = vld [vmem:[%s6330_s8] sm:$0xff]   ;;  %v5443_v31 = vld [vmem:[%s6330_s8 + $0x48] sm:$0xff]  }
 0xb32   : > { %5178 = vmatprep.subr.bf16.mxu0 %v5837_v2  ;;  %5180 = vmatprep.mubr.msk.bf16.mxu0 %vm5838_vm0, %v5837_v2  ;;  %v5444_v32 = vld [vmem:[%s6330_s8 + $0x8] sm:$0xff]   ;;  %v5445_v33 = vld [vmem:[%s6330_s8 + $0x50] sm:$0xff]  }
 0xb33   : > { %5188 = vmatprep.mubr.msk.bf16.mxu1 %vm5838_vm0, %v5837_v2 }
 0xb34   : > { %5187 = vmatpush3.bf16.msra.mxu1 %v5416_v35  ;;  %v5446_v35 = vld [vmem:[%s6330_s8 + $0x10] sm:$0xff]  }
 0xb35   : > { %5179 = vmatpush3.bf16.msra.mxu0 %v5415_v36  ;;  %4809 = vmatprep.subr.bf16.mxu1 %v5441_v29  ;;  %v5447_v36 = vld [vmem:[%s6330_s8 + $0x58] sm:$0xff]  }
 0xb36   : > { %3770 = vmatprep.subr.bf16.mxu0 %v5419_v41  ;;  %v4646_v41 = vld [vmem:[%s6358_s30 + $0x8] ss:$0 sm:$0xff] }
 0xb3c   : > { %v3401_v38 = vpop.f32.mrb[84].mxu1 }
 0xb3d   : > { %v3355_v39 = vpop.f32.mrb[84].mxu0  ;;  %v3410_v40 = vpack.c.bf16 %v3401_v38, %v3401_v38  ;;  %v5158_v43 = vpop.f32.mrb[85].mxu1  ;;  %v5448_v38 = vld [vmem:[%s6330_s8 + $0x18] sm:$0xff]  }
 0xb3e   : > { %v3409_v44 = vpack.c.bf16 %v3355_v39, %v3355_v39  ;;  %v5152_v45 = vpop.f32.mrb[85].mxu0  ;;  %v3404_v46 = vpop.f32.mrb[86].mxu1  ;;  %v5449_v39 = vld [vmem:[%s6330_s8 + $0x60] sm:$0xff]   ;;  %v5451_v43 = vld [vmem:[%s6330_s8 + $0x68] sm:$0xff]  }
 0xb3f   : > { %v3358_v47 = vpop.f32.mrb[86].mxu0  ;;  %v5159_v48 = vpop.f32.mrb[87].mxu1  ;;  %5189 = vmatmul.mubr.msk.bf16.vlgmr.msra.gmra.mrb[92].mxu1 %vm1510_vm1, %v3410_v40  ;;  %v5450_v40 = vld [vmem:[%s6330_s8 + $0x20] sm:$0xff]  }
 0xb40   : > { %v5153_v49 = vpop.f32.mrb[87].mxu0  ;;  %5181 = vmatmul.mubr.msk.bf16.vlgmr.msra.gmra.mrb[92].mxu0 %vm1510_vm1, %v3409_v44  ;;  %4810 = vmatpush3.bf16.msra.mxu1 %v5442_v30  ;;  %v5452_v44 = vld [vmem:[%s6330_s8 + $0x28] sm:$0xff]   ;;  %v3653_v48 = vsub.s32 2, %v6554_v34 }
 0xb41   : > { %3802 = vmatprep.mubr.bf16.mxu0 %v5839_v59  ;;  %v3637_v59 = vrot.slane %v6558_v37, %v3636_v58  ;;  %3771 = vmatpush1.bf16.msra.mxu0 %v5417_v12  ;;  %v3658_v49 = vsub.s32 3, %v6554_v34  ;;  %v5455_v58 = vld [vmem:[%s6330_s8 + $0x78] sm:$0xff]  }
 0xb42   : > { %3772 = vmatprep.subr.bf16.mxu0 %v5422_v42  ;;  %4811 = vmatprep.subr.bf16.mxu1 %v5443_v31 }
 0xb44   : > { %4812 = vmatpush3.bf16.msra.mxu1 %v5444_v32 }
 0xb45   : > { %3773 = vmatpush1.bf16.msra.mxu0 %v5420_v13  ;;  %4813 = vmatprep.subr.bf16.mxu1 %v5445_v33 }
 0xb46   : > { %3774 = vmatprep.subr.bf16.mxu0 %v5425_v14 }
 0xb48   : > { %4814 = vmatpush3.bf16.msra.mxu1 %v5446_v35 }
 0xb49   : > { %3775 = vmatpush1.bf16.msra.mxu0 %v5423_v15  ;;  %4815 = vmatprep.subr.bf16.mxu1 %v5447_v36 }
 0xb4a   : > { %3776 = vmatprep.subr.bf16.mxu0 %v5428_v19 }
 0xb4c   : > { %4816 = vmatpush3.bf16.msra.mxu1 %v5448_v38 }
 0xb4d   : > { %3777 = vmatpush1.bf16.msra.mxu0 %v5426_v20  ;;  %4817 = vmatprep.subr.bf16.mxu1 %v5449_v39 }
 0xb4e   : > { %3778 = vmatprep.subr.bf16.mxu0 %v5431_v21 }
 0xb50   : > { %4818 = vmatpush3.bf16.msra.mxu1 %v5450_v40 }
 0xb51   : > { %3779 = vmatpush1.bf16.msra.mxu0 %v5429_v22  ;;  %4819 = vmatprep.subr.bf16.mxu1 %v5451_v43  ;;  %v4001_v22 = vsub.s32 4, %v6554_v34 }
 0xb52   : > { %3780 = vmatprep.subr.bf16.mxu0 %v5434_v23  ;;  %v4006_v23 = vsub.s32 5, %v6554_v34 }
 0xb54   : > { %4820 = vmatpush3.bf16.msra.mxu1 %v5452_v44 }
 0xb55   : > { %3781 = vmatpush1.bf16.msra.mxu0 %v5432_v24  ;;  %v5496_v24 = vld [vmem:[%s6358_s30] sm:$0xff] }
 0xb56   : > { %3782 = vmatprep.subr.bf16.mxu0 %v5437_v25  ;;  %v4002_v25 = vrot.slane %v5496_v24, %v4001_v22 }
 0xb59   : > { %3783 = vmatpush1.bf16.msra.mxu0 %v5435_v26 }
 0xb5a   : > { %3784 = vmatprep.subr.bf16.mxu0 %v5440_v27  ;;  %v4007_v27 = vrot.slane %v5496_v24, %v4006_v23 }
 0xb5d   : > { %3785 = vmatpush1.bf16.msra.mxu0 %v5438_v28 }
 0xc02   : > { %v3515_v50 = vpop.f32.mrb[88].mxu1 }
 0xc03   : > { %v3460_v2 = vpop.f32.mrb[88].mxu0  ;;  %v5174_v51 = vpop.f32.mrb[89].mxu1 }
 0xc04   : > { %v3631_v52 = vadd.f32 %v3515_v50, %v3460_v2  ;;  %v5166_v53 = vpop.f32.mrb[89].mxu0  ;;  %v3518_v54 = vpop.f32.mrb[90].mxu1  ;;  %v3654_v50 = vrot.slane %v6558_v37, %v3653_v48 }
 0xc05   : > { %v3463_v55 = vpop.f32.mrb[90].mxu0  ;;  %v5175_v56 = vpop.f32.mrb[91].mxu1 }
 0xc06   : > { %v5167_v57 = vpop.f32.mrb[91].mxu0  ;;  %v5453_v56 = vld [vmem:[%s6330_s8 + $0x70] sm:$0xff]  }
 0xc07   : > { %v5454_v57 = vld [vmem:[%s6330_s8 + $0x30] sm:$0xff]   ;;  %4821 = vmatprep.subr.bf16.mxu1 %v5453_v56 }
 0xc08   : > { %4822 = vmatpush3.bf16.msra.mxu1 %v5454_v57 }
 0xc09   : > { %4823 = vmatprep.subr.bf16.mxu1 %v5455_v58 }
 0xc12   : > { %v3625_v60 = vpop.f32.mrb[92].mxu1 }
 0xc13   : > { %v3570_v61 = vpop.f32.mrb[92].mxu0  ;;  %v5190_v0 = vpop.f32.mrb[93].mxu1 }
 0xc14   : > { %v3632_v1 = vadd.f32 %v3631_v52, %v3570_v61  ;;  %v5182_v3 = vpop.f32.mrb[93].mxu0  ;;  %v3628_v4 = vpop.f32.mrb[94].mxu1  ;;  %v3659_v52 = vrot.slane %v6558_v37, %v3658_v49  ;;  %v3678_v61 = vld [vmem:[%s6353_s18] sm:$0x3]  ;;  %s7010_s18 = sld [smem:[#allocation24_spill]] }
 0xc15   : > { %v3573_v5 = vpop.f32.mrb[94].mxu0  ;;  %v5191_v7 = vpop.f32.mrb[95].mxu1  ;;  %v3683_v0 = vrot.slane %v3678_v61, %v6570_v62 }
 0xc16   : > { %v3633_v8 = vadd.f32 %v3632_v1, %v3625_v60  ;;  %v5183_v9 = vpop.f32.mrb[95].mxu0  ;;  %v5456_v60 = vld [vmem:[%s6330_s8 + $0x38] sm:$0xff]   ;;  %v3687_v1 = vrot.slane %v3678_v61, %v2196_v63 }
 0xc17   : > { %4824 = vmatpush3.bf16.msra.mxu1 %v5456_v60 }
 0xc18   : > { %v3638_v10 = vadd.f32 %v3637_v59, %v3633_v8 }
 0xc1a   : > { %v3639_v11 = vadd.f32 %v3638_v10, %v6578_v6  ;;  %p4663_p10 = scmp.ne.s32.totalorder %s7010_s18, 1 }
 0xc1b   : > { %s7011_s17 = sld [smem:[#allocation47_spill]] (!%p4663_p10)  ;;  %v5840_v32 = vmov (!%p4663_p10), 0.0   ;;  %vm5841_vm7 = vmmov (!%p4663_p10), 0   ;;  %s7012_s10 = sld [smem:[#allocation48_spill]] (!%p4663_p10) }
 0xc1c   : > { %3640 = vadd.xlane.f32.xlu0 %v3639_v11  ;;  %5192 = vmatprep.subr.bf16.mxu0 (!%p4663_p10), %v5840_v32 }
 0xc21   : > { %v5497_v31 = vld [vmem:[%s7011_s17] sm:$0xff] (!%p4663_p10)   ;;  %v5498_v34 = vld [vmem:[%s7011_s17 + $0x8] sm:$0xff] (!%p4663_p10)   ;;  %v5499_v33 = vld [vmem:[%s7011_s17 + $0x10] sm:$0xff] (!%p4663_p10)  }
 0xc22   : > { %v5500_v35 = vld [vmem:[%s7011_s17 + $0x18] sm:$0xff] (!%p4663_p10)   ;;  %v5501_v36 = vld [vmem:[%s7011_s17 + $0x20] sm:$0xff] (!%p4663_p10)   ;;  %v5502_v38 = vld [vmem:[%s7011_s17 + $0x28] sm:$0xff] (!%p4663_p10)  }
 0xc23   : > { %v5503_v39 = vld [vmem:[%s7011_s17 + $0x30] sm:$0xff] (!%p4663_p10)   ;;  %v5504_v40 = vld [vmem:[%s7011_s17 + $0x38] sm:$0xff] (!%p4663_p10)   ;;  %v4664_v44 = vld [vmem:[%s7012_s10] ss:$0 sm:$0xff] (!%p4663_p10) }
 0xca9   : > { %v3641_v6 = vpop.xlane.xlu0 %3640 }
 0xcaa   : > { %v3642_v16 = vmul.f32 0.0078125, %v3641_v6 }
 0xcac   : > { %v3643_v17 = vsub.f32 %v3639_v11, %v3642_v16 }
 0xcae   : > { %v3644_v18 = vmul.f32 %v3643_v17, %v3643_v17 }
 0xcb0   : > { %3645 = vadd.xlane.f32.xlu1 %v3644_v18 }
 0xd3d   : > { %v3646_v45 = vpop.xlane.xlu1 %3645 }
 0xd3e   : > { %v3647_v46 = vmul.f32 0.0078125, %v3646_v45 }
 0xd40   : > { %v3648_v47 = vadd.f32 1e-12, %v3647_v46 }
 0xd42   : > { %5491 = vrsqrt.f32 %v3648_v47 }
 0xd4c   : > { %v5492_v2 = vpop.eup %5491 }
 0xd4d   : > { %v3650_v51 = vmul.f32 %v5492_v2, %v3643_v17 }
 0xd4f   : > { %v3655_v53 = vmul.f32 %v3654_v50, %v3650_v51 }
 0xd51   : > { %v3660_v54 = vadd.f32 %v3659_v52, %v3655_v53 }
 0xd53   : > { %v3661_v55 = vpack.c.bf16 %v3660_v54, %v3660_v54 }
 0xd55   : > { %3803 = vmatmul.mubr.bf16.vlgmr.msra.gmra.mrb[96].mxu0 %v3661_v55 }
 0xd56   : > { %5193 = vmatpush3.bf16.msra.mxu0 (!%p4663_p10), %v5497_v31  ;;  %5208 = vmatprep.mubr.msk.bf16.mxu0 (!%p4663_p10), %vm5841_vm7, %v5840_v32 }
 0xd57   : > { %5194 = vmatprep.subr.bf16.mxu0 (!%p4663_p10), %v5840_v32 }
 0xd5a   : > { %5195 = vmatpush3.bf16.msra.mxu0 (!%p4663_p10), %v5498_v34 }
 0xd5b   : > { %5196 = vmatprep.subr.bf16.mxu0 (!%p4663_p10), %v5840_v32 }
 0xd5e   : > { %5197 = vmatpush3.bf16.msra.mxu0 (!%p4663_p10), %v5499_v33 }
 0xd5f   : > { %5198 = vmatprep.subr.bf16.mxu0 (!%p4663_p10), %v5840_v32 }
 0xd62   : > { %5199 = vmatpush3.bf16.msra.mxu0 (!%p4663_p10), %v5500_v35 }
 0xd63   : > { %5200 = vmatprep.subr.bf16.mxu0 (!%p4663_p10), %v5840_v32 }
 0xd66   : > { %5201 = vmatpush3.bf16.msra.mxu0 (!%p4663_p10), %v5501_v36 }
 0xd67   : > { %5202 = vmatprep.subr.bf16.mxu0 (!%p4663_p10), %v5840_v32 }
 0xd6a   : > { %5203 = vmatpush3.bf16.msra.mxu0 (!%p4663_p10), %v5502_v38 }
 0xd6b   : > { %5204 = vmatprep.subr.bf16.mxu0 (!%p4663_p10), %v5840_v32 }
 0xd6e   : > { %5205 = vmatpush3.bf16.msra.mxu0 (!%p4663_p10), %v5503_v39 }
 0xd6f   : > { %5206 = vmatprep.subr.bf16.mxu0 (!%p4663_p10), %v5840_v32 }
 0xd72   : > { %5207 = vmatpush3.bf16.msra.mxu0 (!%p4663_p10), %v5504_v40 }
 0xe28   : > { %v3804_v37 = vpop.f32.mrb[96].mxu0 }
 0xe29   : > { %v3805_v59 = vadd.f32 %v3804_v37, %v3683_v0  ;;  %v3806_v3 = vpop.f32.mrb[97].mxu0 }
 0xe2a   : > { %v3807_v4 = vadd.f32 %v3806_v3, %v3687_v1  ;;  %v3808_v5 = vpop.f32.mrb[98].mxu0 }
 0xe2b   : > { %v3811_v7 = vmax.f32 %v3805_v59, 0.0  ;;  %v3809_v8 = vpop.f32.mrb[99].mxu0 }
 0xe2c   : > { %v3812_v9 = vmax.f32 %v3807_v4, 0.0 }
 0xe2d   : > { %v3813_v11 = vpack.c.bf16 %v3811_v7, %v3811_v7 }
 0xe2e   : > { %v3814_v10 = vpack.c.bf16 %v3812_v9, %v3812_v9 }
 0xe30   : > { %3979 = vmatprep.mubr.bf16.mxu1 %v3814_v10 }
 0xe31   : > { %3980 = vmatmul.mubr.bf16.vlgmr.msra.gmra.mrb[96].mxu1 %v3813_v11 }
 0xf04   : > { %v4825_v12 = vpop.f32.mrb[96].mxu1 }
 0xf05   : > { %v4826_v42 = vpop.f32.mrb[97].mxu1 }
 0xf06   : > { %v4827_v13 = vadd.f32 %v4826_v42, %v4825_v12  ;;  %v4828_v62 = vpop.f32.mrb[98].mxu1 }
 0xf07   : > { %v4829_v14 = vpop.f32.mrb[99].mxu1 }
 0xf08   : > { %v3982_v63 = vadd.f32 %v4827_v13, %v4646_v41 }
 0xf0a   : > { %v3987_v15 = vadd.f32 %v3982_v63, %v3660_v54 }
 0xf0c   : > { %3988 = vadd.xlane.f32.xlu0 %v3987_v15 }
 0xf99   : > { %v3989_v6 = vpop.xlane.xlu0 %3988 }
 0xf9a   : > { %v3990_v16 = vmul.f32 0.0078125, %v3989_v6 }
 0xf9c   : > { %v3991_v17 = vsub.f32 %v3987_v15, %v3990_v16 }
 0xf9e   : > { %v3992_v18 = vmul.f32 %v3991_v17, %v3991_v17 }
 0xfa0   : > { %3993 = vadd.xlane.f32.xlu1 %v3992_v18 }
0x102d   : > { %v3994_v19 = vpop.xlane.xlu1 %3993 }
0x102e   : > { %v3995_v20 = vmul.f32 0.0078125, %v3994_v19 }
0x1030   : > { %v3996_v21 = vadd.f32 1e-12, %v3995_v20 }
0x1032   : > { %5493 = vrsqrt.f32 %v3996_v21 }
0x103c   : > { %v5494_v26 = vpop.eup %5493 }
0x103d   : > { %v3998_v28 = vmul.f32 %v5494_v26, %v3991_v17  ;;  %4013 = sbr.rel (%p4663_p10) target bundleno = 4380 (0x111c), region = 100 }
0x103f   : > { %v4003_v29 = vmul.f32 %v4002_v25, %v3998_v28 }
0x1041   : > { %v4008_v30 = vadd.f32 %v4007_v27, %v4003_v29 }
0x1043   : > { %4009 = vst [vmem:[#allocation2] sm:$0xff] %v4008_v30  ;;  %v4014_v43 = vpack.c.bf16 (!%p4663_p10), %v4008_v30, %v4008_v30 }
0x1045   : > { %5209 = vmatmul.mubr.bf16.vlgmr.msra.gmra.mrb[0].mxu0 %v4014_v43 }
0x1118   : > { %v4120_v45 = vpop.f32.mrb[0].mxu0 }
0x1119   : > { %v4121_v46 = vadd.f32 %v4664_v44, %v4120_v45  ;;  %v5210_v47 = vpop.f32.mrb[1].mxu0 }
0x111a   : > { %v4123_v48 = vpop.f32.mrb[2].mxu0 }
0x111b   : > { %4126 = vst [vmem:[%s683_s29] sm:$0xff] %v4121_v46  ;;  %v5211_v49 = vpop.f32.mrb[3].mxu0 }
0x111c PF: > { %s7013_s1 = sld [smem:[#allocation25_spill]]  ;;  %s7014_s4 = sld [smem:[#allocation35_spill]] }
0x111d   : > { %s7015_s18 = sld [smem:[#allocation49_spill]]  ;;  %s4141_s27 = sshll.u32 %s683_s29, 4  ;;  %s4142_s27 = int_to_ptr.vmem [resolvable:$true] %s4141_s27 }
0x111e   : > { %s4128_s8 = scalar_lea.sflag [#allocation5], %s6298_s28  ;;  %s5685_s5 = scalar_lea.vmem %s4142_s27, 128 }
0x111f   : > { %p5686_p11 = scmp.ne.s32.totalorder %s4142_s27, %s5685_s5  ;;  %s5842_s30 = smov [#allocation14]  }
0x1120   : > { %s5689_s2 = sshll.u32 %s5842_s30, 4  ;;  %s5690_s2 = int_to_ptr.vmem [resolvable:$false] %s5689_s2 }
0x1121   : > { %s5691_s20 = scalar_lea.vmem %s5690_s2, 256  ;;  %p5692_p3 = scmp.lt.s32.totalorder %s4142_s27, %s5690_s2 }
0x1122   : > { %s4674_s6 = sshll.u32 %s7013_s1, 7  ;;  %p7016_p6 = scmp.ne.s32.totalorder %s7014_s4, 0 }
0x1123   : > { %s6837_s14 = scalar_lea.hbm %s7015_s18, %s4674_s6  ;;  %p5693_p8 = scmp.lt.s32.totalorder %s5691_s20, %s5685_s5 }
0x1124   : > { %p5687_p7 = pnand %p5686_p11, %p7016_p6 }
0x1125   : > { %p5694_p2 = por %p5693_p8, %p5692_p3 }
0x1126   : > { %p5688_p4 = pneg %p5687_p7 }
0x1128   : > { %p5695_p0 = pnand %p5694_p2, %p5688_p4 }
0x112a   : > { %5698 = shalt.err (!%p5695_p0)
}
0x112b   : > { %s5699_s29 = scalar_lea.hbm %s6837_s14, 128  ;;  %s5703_s12 = scalar_lea.hbm %s7015_s18, 256 }
0x112c   : > { %p5700_p5 = scmp.ne.s32.totalorder %s6837_s14, %s5699_s29  ;;  %p5704_p9 = scmp.lt.u32.totalorder %s6837_s14, %s7015_s18 }
0x112d   : > { %p5705_p13 = scmp.lt.u32.totalorder %s5703_s12, %s5699_s29  ;;  %p5707_p11 = scmp.lt.u32.totalorder %s5699_s29, %s6837_s14 }
0x112e   : > { %p5701_p12 = pnand %p5700_p5, %p7016_p6 }
0x112f   : > { %p5706_p10 = por %p5705_p13, %p5704_p9 }
0x1130   : > { %p5702_p1 = pneg %p5701_p12 }
0x1131   : > { %p5708_p7 = por %p5707_p11, %p5706_p10 }
0x1133   : > { %p5709_p4 = pnand %p5708_p7, %p5702_p1 }
0x1135   : > { %5712 = shalt.err (!%p5709_p4)
}
0x1136   : > { %5227 = dma.vmem_to_hbm [thread:$0]  (%p7016_p6), %s4142_s27, 128, %s6837_s14, %s4128_s8  }
0x1137 PF: > { %s7017_s16 = sld [smem:[#allocation28_spill]]  ;;  %s7018_s15 = sld [smem:[#allocation23_spill]] }
0x1138   : > { %s7019_s9 = sld [smem:[#allocation36_spill]] }
0x113d   : > { %p5253_p3 = scmp.ge.s32.totalorder %s7017_s16, 2  ;;  %s4153_s13 = sand.u32 1, %s7018_s15  }
0x113e   : > { %p7020_p8 = scmp.ne.s32.totalorder %s7019_s9, 0  ;;  %s4154_s24 = scalar_lea.sflag [#allocation5], %s4153_s13 }
0x1140   : > { %p5249_p2 = pnand %p5253_p3, %p7020_p8 }
0x1142   : > { %5778 = dma.done.wait (!%p5249_p2), %s4154_s24, 128  }
0x1143   : > { %5780 = vsyncadd (!%p5249_p2), %s4154_s24, 4294967168  ;;  %s37_s13 = sadd.s32 1, %s7017_s16   ;;  %s7021_s21 = sld [smem:[#allocation21_spill]] }
0x1144   : > { %p34_p0 = scmp.ge.s32.totalorder %s37_s13, 6   ;;  %s7022_s22 = sld [smem:[#allocation22_spill]] }
0x1145   : > { %s7023_s23 = sld [smem:[#allocation32_spill]]  ;;  %s7024_s11 = sld [smem:[#allocation33_spill]] }
0x1146   : > { %s7025_s27 = sld [smem:[#allocation26_spill]]  ;;  %s7026_s28 = sld [smem:[#allocation27_spill]] }
0x1147   : > { %s7027_s29 = sld [smem:[#allocation30_spill]]  ;;  %s7028_s30 = sld [smem:[#allocation31_spill]] }
0x1148   : > { %s7029_s24 = smov %s5799_s25  ;;  %s7030_s25 = smov %s5803_s26 }
0x1149   :  { %36 = sbr.rel (!%p34_p0) target bundleno = 29 (0x1d), region = 201 }
0x114b   : > { %s7031_s26 = smov %s7024_s11 }
0x1150   :  { %4159 = vsyncpa [#allocation4], 1 }
0x1151   :  { %4161 = vsyncpa [#allocation4 + $0x1], 1 }
0x1152   :  { %4162 = vsyncpa [#allocation7], 1 }
0x1153   :  { %4164 = vsyncpa [#allocation7 + $0x1], 1 }
0x1154   :  { %4165 = vsyncpa [#allocation10], 1 }
0x1155   :  { %4167 = vsyncpa [#allocation10 + $0x1], 1 }
0x1156   :  { %4168 = vsyncpa [#allocation13], 1 }
0x1157   :  { %4170 = vsyncpa [#allocation13 + $0x1], 1 }
0x1158   :  { %4171 = vsyncpa [#allocation5], 1 }
0x1159   :  { %4173 = vsyncpa [#allocation5 + $0x1], 1 }

</bundles_post_ra>
